<compile_context>
chip_gen: v7x
topology: tpu7x:2x2x1
jax: 0.10.0
libtpu: 0.0.40
codegen_flags: <defaults>
</compile_context>

<pallas_src>
import functools

import jax
import jax.numpy as jnp
from jax.experimental import pallas as pl
from jax.experimental.pallas import tpu as pltpu

LANE = 128               # lane count
BATCH_ALIGN = 8          # f32 sublane count


def _round_up(x, m):
    return (x + m - 1) // m * m


def _choose_batch_block(batch):
    """Large batch blocks; aim for >=2 grid steps (v7x megacore) when batch allows."""
    if batch <= 8:
        return 8
    if batch <= 512:
        return _round_up((batch + 1) // 2, BATCH_ALIGN)   # two balanced blocks
    return 256


def _permute_gate_cols(w, H):
    """Reorder gate blocks along the last dim: PyTorch (i, f, g, o) -> (i, f, o, g)."""
    i, f, g, o = (w[..., 0 * H:1 * H], w[..., 1 * H:2 * H],
                  w[..., 2 * H:3 * H], w[..., 3 * H:4 * H])
    return jnp.concatenate([i, f, o, g], axis=-1)


def make_lstm_kernel(num_layers: int, T: int, H: int, bblk: int):
    """Kernel body for a fixed (static) layer count / sequence length / hidden size."""
    # Full unroll only while the live set stays small; bounded unroll for fat blocks.
    unroll = True if bblk <= 32 else 2

    def kernel(x_ref, *refs):
        # refs layout:
        #   [w_ih_T(bf16), w_hh_T(bf16), bias(f32)] * num_layers, fc_w_T(bf16), fc_b,
        #   out_ref,                                               (output)
        #   gates_ref [T, Bblk, 4H] f32, hseq_ref [T, Bblk, H] f32 (VMEM scratch)
        layer_refs = refs[:3 * num_layers]
        fcw_ref = refs[3 * num_layers]
        fcb_ref = refs[3 * num_layers + 1]
        out_ref = refs[3 * num_layers + 2]
        gates_ref = refs[3 * num_layers + 3]
        hseq_ref = refs[3 * num_layers + 4]

        Bblk = x_ref.shape[1]
        G = 4 * H

        h_top = None
        for l in range(num_layers):                       # static unroll over layers
            wih = layer_refs[3 * l][...]                  # bf16 [D_in(pad), 4H], (i,f,o,g)
            whh = layer_refs[3 * l + 1][...]              # bf16 [H, 4H], (i,f,o,g)
            bias = layer_refs[3 * l + 2][...]             # f32  [1, 4H], (i,f,o,g)

            # ---- time-parallel input projection: one big bf16 MXU GEMM per layer ----
            if l == 0:
                xin = x_ref[...].reshape(T * Bblk, x_ref.shape[2]).astype(jnp.bfloat16)
            else:
                xin = hseq_ref[...].reshape(T * Bblk, H).astype(jnp.bfloat16)
            z_all = jnp.dot(xin, wih, preferred_element_type=jnp.float32) + bias
            gates_ref[...] = z_all.reshape(T, Bblk, G)

            write_hseq = l < num_layers - 1

            # ---- serial recurrence: only h @ W_hh + gate math remains per step ----
            def step(t, carry):
                h, c = carry
                z = gates_ref[t] + jnp.dot(h.astype(jnp.bfloat16), whh,
                                           preferred_element_type=jnp.float32)
                # permuted gate layout: [ i | f | o | g ]
                sg = jax.nn.sigmoid(z[:, :3 * H])         # i, f, o in one EUP pass
                g_g = jnp.tanh(z[:, 3 * H:])              # g only
                i_g = sg[:, 0 * H:1 * H]
                f_g = sg[:, 1 * H:2 * H]
                o_g = sg[:, 2 * H:3 * H]
                c_new = f_g * c + i_g * g_g
                h_new = o_g * jnp.tanh(c_new)
                if write_hseq:
                    hseq_ref[t] = h_new                   # becomes next layer's input
                return (h_new, c_new)

            init = (jnp.zeros((Bblk, H), jnp.float32),
                    jnp.zeros((Bblk, H), jnp.float32))
            h_top, _ = jax.lax.fori_loop(0, T, step, init, unroll=unroll)

        logits = (jnp.dot(h_top.astype(jnp.bfloat16), fcw_ref[...],
                          preferred_element_type=jnp.float32) + fcb_ref[...])
        out_ref[...] = logits.astype(out_ref.dtype)

    return kernel


def init_params(key, input_dim, hidden_dim, num_layers, num_classes):
    """Deterministic parameter init mirroring nn.LSTM / nn.Linear shapes (PyTorch layout)."""
    params = {}
    k_lstm = 1.0 / jnp.sqrt(hidden_dim)
    keys = jax.random.split(key, 4 * num_layers + 2)
    ki = 0
    for l in range(num_layers):
        in_dim = input_dim if l == 0 else hidden_dim
        w_ih = jax.random.uniform(keys[ki], (4 * hidden_dim, in_dim),
                                  jnp.float32, -k_lstm, k_lstm); ki += 1
        w_hh = jax.random.uniform(keys[ki], (4 * hidden_dim, hidden_dim),
                                  jnp.float32, -k_lstm, k_lstm); ki += 1
        b_ih = jax.random.uniform(keys[ki], (4 * hidden_dim,),
                                  jnp.float32, -k_lstm, k_lstm); ki += 1
        b_hh = jax.random.uniform(keys[ki], (4 * hidden_dim,),
                                  jnp.float32, -k_lstm, k_lstm); ki += 1
        params[f"w_ih_{l}"] = w_ih
        params[f"w_hh_{l}"] = w_hh
        params[f"b_{l}"] = b_ih + b_hh
    k_fc = 1.0 / jnp.sqrt(hidden_dim)
    params["fc_w"] = jax.random.uniform(keys[ki], (num_classes, hidden_dim),
                                        jnp.float32, -k_fc, k_fc); ki += 1
    params["fc_b"] = jax.random.uniform(keys[ki], (num_classes,),
                                        jnp.float32, -k_fc, k_fc)
    return params


def prepare_kernel_params(params, input_dim, hidden_dim, num_layers, num_classes):
    """One-time transpose / gate-permute / pad / bf16-cast of weights into kernel layout.

    Done OUTSIDE the jitted forward so this work is never re-executed per call.
    """
    H = hidden_dim
    d_pad = _round_up(input_dim, LANE)      # lane-dense layer-0 GEMM contraction dim
    c_pad = _round_up(num_classes, LANE)    # lane-dense logits slab
    prepped = []
    for l in range(num_layers):
        w_ih_t = _permute_gate_cols(jnp.transpose(params[f"w_ih_{l}"]), H)   # [D_in, 4H]
        if l == 0:
            w_ih_t = jnp.pad(w_ih_t, ((0, d_pad - input_dim), (0, 0)))
        w_hh_t = _permute_gate_cols(jnp.transpose(params[f"w_hh_{l}"]), H)   # [H, 4H]
        bias = _permute_gate_cols(params[f"b_{l}"].reshape(1, -1), H)        # [1, 4H]
        prepped.append(w_ih_t.astype(jnp.bfloat16))
        prepped.append(w_hh_t.astype(jnp.bfloat16))
        prepped.append(bias.astype(jnp.float32))
    fc_w_t = jnp.pad(jnp.transpose(params["fc_w"]),
                     ((0, 0), (0, c_pad - num_classes)))                     # [H, Cpad]
    fc_b = jnp.pad(params["fc_b"], (0, c_pad - num_classes)).reshape(1, -1)  # [1, Cpad]
    prepped.append(fc_w_t.astype(jnp.bfloat16))
    prepped.append(fc_b.astype(jnp.float32))
    return tuple(jax.device_put(p) for p in prepped)


@functools.partial(jax.jit,
                   static_argnames=("hidden_dim", "num_layers", "num_classes"))
def lstm_based_model(x, kernel_params, *, hidden_dim, num_layers, num_classes):
    """x: [B, T, D] -> logits [B, num_classes] (matches the PyTorch forward, eval mode)."""
    B, T, D = x.shape
    H = hidden_dim
    G = 4 * H
    d_pad = kernel_params[0].shape[0]       # padded layer-0 input dim
    c_pad = kernel_params[-1].shape[1]      # padded class dim

    bblk = _choose_batch_block(B)
    b_pad = _round_up(B, bblk)
    n_blocks = b_pad // bblk

    # time-major, batch padded to the block size, feature dim padded to lane multiple
    x_tm = jnp.transpose(x, (1, 0, 2)).astype(jnp.float32)          # [T, B, D]
    x_tm = jnp.pad(x_tm, ((0, 0), (0, b_pad - B), (0, d_pad - D)))  # [T, Bp, Dp]

    in_specs = [pl.BlockSpec((T, bblk, d_pad), lambda b: (0, b, 0))]
    # weights / biases: whole array resident, block index never changes across grid
    in_specs += [pl.BlockSpec(p.shape, lambda b: (0, 0)) for p in kernel_params]

    out = pl.pallas_call(
        make_lstm_kernel(num_layers, T, H, bblk),
        out_shape=jax.ShapeDtypeStruct((b_pad, c_pad), jnp.float32),
        grid=(n_blocks,),
        in_specs=in_specs,
        out_specs=pl.BlockSpec((bblk, c_pad), lambda b: (b, 0)),
        scratch_shapes=[
            pltpu.VMEM((T, bblk, G), jnp.float32),   # precomputed gate inputs
            pltpu.VMEM((T, bblk, H), jnp.float32),   # hidden seq -> next layer's input
        ],
        # Footprint stays well under the default scoped-VMEM limit even at bblk=256
        # (~7 MiB incl. double-buffered x block); "parallel" lets v7x split the
        # independent batch blocks across its two TensorCores.
        compiler_params=pltpu.CompilerParams(dimension_semantics=("parallel",)),
    )(x_tm, *kernel_params)

    return out[:B, :num_classes]


def reference_forward(x, params, hidden_dim, num_layers):
    """Pure-JAX f32 reference (same math as the PyTorch module in eval mode)."""
    B, T, D = x.shape
    H = hidden_dim
    h = [jnp.zeros((B, H), jnp.float32) for _ in range(num_layers)]
    c = [jnp.zeros((B, H), jnp.float32) for _ in range(num_layers)]
    for t in range(T):
        inp = x[:, t, :]
        for l in range(num_layers):
            z = (inp @ params[f"w_ih_{l}"].T + h[l] @ params[f"w_hh_{l}"].T
                 + params[f"b_{l}"])
            i_g = jax.nn.sigmoid(z[:, :H])
            f_g = jax.nn.sigmoid(z[:, H:2 * H])
            g_g = jnp.tanh(z[:, 2 * H:3 * H])
            o_g = jax.nn.sigmoid(z[:, 3 * H:])
            c[l] = f_g * c[l] + i_g * g_g
            h[l] = o_g * jnp.tanh(c[l])
            inp = h[l]
    return h[-1] @ params["fc_w"].T + params["fc_b"]


if __name__ == "__main__":
    # Module hyper-params (defaults of the PyTorch module where given).
    hidden_dim = 32
    num_layers = 2
    num_classes = 4
    num_antennas = 3
    num_subcarriers = 30
    num_time_slices = 10
    input_dim = num_antennas * num_subcarriers * 2      # 180

    batch = 2
    key = jax.random.PRNGKey(0)
    k_x, k_p = jax.random.split(key)
    x = jax.random.normal(k_x, (batch, num_time_slices, input_dim), jnp.float32)

    params = init_params(k_p, input_dim, hidden_dim, num_layers, num_classes)
    kernel_params = prepare_kernel_params(params, input_dim, hidden_dim,
                                          num_layers, num_classes)

    logits = lstm_based_model(x, kernel_params, hidden_dim=hidden_dim,
                              num_layers=num_layers, num_classes=num_classes)
    logits = jax.block_until_ready(logits)

    ref = reference_forward(x, params, hidden_dim, num_layers)
    assert logits.shape == (batch, num_classes)
    # bf16 MXU operands (f32 accumulation / state) -> relaxed tolerance vs f32 reference.
    max_err = float(jnp.max(jnp.abs(logits - ref)))
    assert max_err < 7.5e-2, f"mismatch vs reference (max abs err {max_err})"

    print("KERNEL_OK")
</pallas_src>

<mosaic_0001>
module attributes {stable_mosaic.version = 11 : i64} {
  func.func @kernel(%arg0: i32, %arg1: memref<10x8x256xf32, #tpu.memory_space<vmem>>, %arg2: memref<256x128xbf16, #tpu.memory_space<vmem>>, %arg3: memref<32x128xbf16, #tpu.memory_space<vmem>>, %arg4: memref<1x128xf32, #tpu.memory_space<vmem>>, %arg5: memref<32x128xbf16, #tpu.memory_space<vmem>>, %arg6: memref<32x128xbf16, #tpu.memory_space<vmem>>, %arg7: memref<1x128xf32, #tpu.memory_space<vmem>>, %arg8: memref<32x128xbf16, #tpu.memory_space<vmem>>, %arg9: memref<1x128xf32, #tpu.memory_space<vmem>>, %arg10: memref<8x128xf32, #tpu.memory_space<vmem>>, %arg11: memref<10x8x128xf32, #tpu.memory_space<vmem>>, %arg12: memref<10x8x32xf32, #tpu.memory_space<vmem>>) attributes {dimension_semantics = [#tpu.dimension_semantics<parallel>], iteration_bounds = array<i64: 1>, scalar_prefetch = 0 : i64, scratch_operands = 2 : i64, tpu.core_type = #tpu.core_type<tc>, window_params = [{transform_indices = @transform_0, window_bounds = array<i64: 10, 8, 256>}, {pipeline_mode = #tpu.pipeline_mode<synchronous>, transform_indices = @transform_1, window_bounds = array<i64: 256, 128>}, {pipeline_mode = #tpu.pipeline_mode<synchronous>, transform_indices = @transform_2, window_bounds = array<i64: 32, 128>}, {pipeline_mode = #tpu.pipeline_mode<synchronous>, transform_indices = @transform_3, window_bounds = array<i64: 1, 128>}, {pipeline_mode = #tpu.pipeline_mode<synchronous>, transform_indices = @transform_4, window_bounds = array<i64: 32, 128>}, {pipeline_mode = #tpu.pipeline_mode<synchronous>, transform_indices = @transform_5, window_bounds = array<i64: 32, 128>}, {pipeline_mode = #tpu.pipeline_mode<synchronous>, transform_indices = @transform_6, window_bounds = array<i64: 1, 128>}, {pipeline_mode = #tpu.pipeline_mode<synchronous>, transform_indices = @transform_7, window_bounds = array<i64: 32, 128>}, {pipeline_mode = #tpu.pipeline_mode<synchronous>, transform_indices = @transform_8, window_bounds = array<i64: 1, 128>}, {transform_indices = @transform_9, window_bounds = array<i64: 8, 128>}]} {
    %c0 = arith.constant 0 : index
    %c0_0 = arith.constant 0 : index
    %0 = vector.load %arg2[%c0, %c0_0] : memref<256x128xbf16, #tpu.memory_space<vmem>>, vector<256x128xbf16>
    %c0_1 = arith.constant 0 : index
    %c0_2 = arith.constant 0 : index
    %1 = vector.load %arg3[%c0_1, %c0_2] : memref<32x128xbf16, #tpu.memory_space<vmem>>, vector<32x128xbf16>
    %c0_3 = arith.constant 0 : index
    %c0_4 = arith.constant 0 : index
    %2 = vector.load %arg4[%c0_3, %c0_4] : memref<1x128xf32, #tpu.memory_space<vmem>>, vector<1x128xf32>
    %c0_5 = arith.constant 0 : index
    %c0_6 = arith.constant 0 : index
    %c0_7 = arith.constant 0 : index
    %3 = vector.load %arg1[%c0_5, %c0_6, %c0_7] : memref<10x8x256xf32, #tpu.memory_space<vmem>>, vector<10x8x256xf32>
    %4 = vector.shape_cast %3 : vector<10x8x256xf32> to vector<80x256xf32>
    %5 = arith.truncf %4 : vector<80x256xf32> to vector<80x256xbf16>
    %cst = arith.constant dense<0.000000e+00> : vector<80x128xf32>
    %6 = tpu.matmul %5, %0, %cst {dimension_numbers = #tpu.dot_dimension_numbers<[1], [0], [0], [1], [0, 0, 1, 1], [], []>} : vector<80x256xbf16>, vector<256x128xbf16>, vector<80x128xf32> -> vector<80x128xf32>
    %7 = vector.broadcast %2 : vector<1x128xf32> to vector<80x128xf32>
    %8 = arith.addf %6, %7 : vector<80x128xf32>
    %9 = vector.shape_cast %8 : vector<80x128xf32> to vector<10x8x128xf32>
    %c0_8 = arith.constant 0 : index
    %c0_9 = arith.constant 0 : index
    %c0_10 = arith.constant 0 : index
    %10 = vector.load %arg11[%c0_8, %c0_9, %c0_10] : memref<10x8x128xf32, #tpu.memory_space<vmem>>, vector<10x8x128xf32>
    tpu.vector_store %arg11[%c0_8, %c0_9, %c0_10], %9 {strides = array<i32>} : memref<10x8x128xf32, #tpu.memory_space<vmem>>, vector<10x8x128xf32>,
    %cst_11 = arith.constant 0.000000e+00 : f32
    %11 = vector.broadcast %cst_11 : f32 to vector<8x32xf32>
    %cst_12 = arith.constant 0.000000e+00 : f32
    %12 = vector.broadcast %cst_12 : f32 to vector<8x32xf32>
    %c0_i32 = arith.constant 0 : i32
    %13 = arith.index_cast %c0_i32 : i32 to index
    %c0_13 = arith.constant 0 : index
    %c0_14 = arith.constant 0 : index
    %14 = vector.load %arg11[%13, %c0_13, %c0_14] : memref<10x8x128xf32, #tpu.memory_space<vmem>>, vector<1x8x128xf32>
    %15 = vector.shape_cast %14 : vector<1x8x128xf32> to vector<8x128xf32>
    %16 = arith.truncf %11 : vector<8x32xf32> to vector<8x32xbf16>
    %cst_15 = arith.constant dense<0.000000e+00> : vector<8x128xf32>
    %17 = tpu.matmul %16, %1, %cst_15 {dimension_numbers = #tpu.dot_dimension_numbers<[1], [0], [0], [1], [0, 0, 1, 1], [], []>} : vector<8x32xbf16>, vector<32x128xbf16>, vector<8x128xf32> -> vector<8x128xf32>
    %18 = arith.addf %15, %17 : vector<8x128xf32>
    %19 = vector.extract_strided_slice %18 {offsets = [0, 0], sizes = [8, 96], strides = [1, 1]} : vector<8x128xf32> to vector<8x96xf32>
    %20 = arith.negf %19 : vector<8x96xf32>
    %21 = math.exp %20 : vector<8x96xf32>
    %cst_16 = arith.constant 1.000000e+00 : f32
    %22 = vector.broadcast %cst_16 : f32 to vector<8x96xf32>
    %23 = arith.addf %22, %21 : vector<8x96xf32>
    %24 = arith.divf %22, %23 : vector<8x96xf32>
    %25 = vector.extract_strided_slice %18 {offsets = [0, 96], sizes = [8, 32], strides = [1, 1]} : vector<8x128xf32> to vector<8x32xf32>
    %26 = math.tanh %25 : vector<8x32xf32>
    %27 = vector.extract_strided_slice %24 {offsets = [0, 0], sizes = [8, 32], strides = [1, 1]} : vector<8x96xf32> to vector<8x32xf32>
    %28 = vector.extract_strided_slice %24 {offsets = [0, 32], sizes = [8, 32], strides = [1, 1]} : vector<8x96xf32> to vector<8x32xf32>
    %29 = vector.extract_strided_slice %24 {offsets = [0, 64], sizes = [8, 32], strides = [1, 1]} : vector<8x96xf32> to vector<8x32xf32>
    %30 = arith.mulf %28, %12 : vector<8x32xf32>
    %31 = arith.mulf %27, %26 : vector<8x32xf32>
    %32 = arith.addf %30, %31 : vector<8x32xf32>
    %33 = math.tanh %32 : vector<8x32xf32>
    %34 = arith.mulf %29, %33 : vector<8x32xf32>
    %35 = arith.index_cast %c0_i32 : i32 to index
    %c0_17 = arith.constant 0 : index
    %c0_18 = arith.constant 0 : index
    %36 = vector.load %arg12[%35, %c0_17, %c0_18] : memref<10x8x32xf32, #tpu.memory_space<vmem>>, vector<1x8x32xf32>
    %37 = vector.shape_cast %36 : vector<1x8x32xf32> to vector<8x32xf32>
    %38 = vector.shape_cast %34 : vector<8x32xf32> to vector<1x8x32xf32>
    tpu.vector_store %arg12[%35, %c0_17, %c0_18], %38 {strides = array<i32>} : memref<10x8x32xf32, #tpu.memory_space<vmem>>, vector<1x8x32xf32>,
    %c1_i32 = arith.constant 1 : i32
    %39 = arith.index_cast %c1_i32 : i32 to index
    %c0_19 = arith.constant 0 : index
    %c0_20 = arith.constant 0 : index
    %40 = vector.load %arg11[%39, %c0_19, %c0_20] : memref<10x8x128xf32, #tpu.memory_space<vmem>>, vector<1x8x128xf32>
    %41 = vector.shape_cast %40 : vector<1x8x128xf32> to vector<8x128xf32>
    %42 = arith.truncf %34 : vector<8x32xf32> to vector<8x32xbf16>
    %cst_21 = arith.constant dense<0.000000e+00> : vector<8x128xf32>
    %43 = tpu.matmul %42, %1, %cst_21 {dimension_numbers = #tpu.dot_dimension_numbers<[1], [0], [0], [1], [0, 0, 1, 1], [], []>} : vector<8x32xbf16>, vector<32x128xbf16>, vector<8x128xf32> -> vector<8x128xf32>
    %44 = arith.addf %41, %43 : vector<8x128xf32>
    %45 = vector.extract_strided_slice %44 {offsets = [0, 0], sizes = [8, 96], strides = [1, 1]} : vector<8x128xf32> to vector<8x96xf32>
    %46 = arith.negf %45 : vector<8x96xf32>
    %47 = math.exp %46 : vector<8x96xf32>
    %cst_22 = arith.constant 1.000000e+00 : f32
    %48 = vector.broadcast %cst_22 : f32 to vector<8x96xf32>
    %49 = arith.addf %48, %47 : vector<8x96xf32>
    %50 = arith.divf %48, %49 : vector<8x96xf32>
    %51 = vector.extract_strided_slice %44 {offsets = [0, 96], sizes = [8, 32], strides = [1, 1]} : vector<8x128xf32> to vector<8x32xf32>
    %52 = math.tanh %51 : vector<8x32xf32>
    %53 = vector.extract_strided_slice %50 {offsets = [0, 0], sizes = [8, 32], strides = [1, 1]} : vector<8x96xf32> to vector<8x32xf32>
    %54 = vector.extract_strided_slice %50 {offsets = [0, 32], sizes = [8, 32], strides = [1, 1]} : vector<8x96xf32> to vector<8x32xf32>
    %55 = vector.extract_strided_slice %50 {offsets = [0, 64], sizes = [8, 32], strides = [1, 1]} : vector<8x96xf32> to vector<8x32xf32>
    %56 = arith.mulf %54, %32 : vector<8x32xf32>
    %57 = arith.mulf %53, %52 : vector<8x32xf32>
    %58 = arith.addf %56, %57 : vector<8x32xf32>
    %59 = math.tanh %58 : vector<8x32xf32>
    %60 = arith.mulf %55, %59 : vector<8x32xf32>
    %61 = arith.index_cast %c1_i32 : i32 to index
    %c0_23 = arith.constant 0 : index
    %c0_24 = arith.constant 0 : index
    %62 = vector.load %arg12[%61, %c0_23, %c0_24] : memref<10x8x32xf32, #tpu.memory_space<vmem>>, vector<1x8x32xf32>
    %63 = vector.shape_cast %62 : vector<1x8x32xf32> to vector<8x32xf32>
    %64 = vector.shape_cast %60 : vector<8x32xf32> to vector<1x8x32xf32>
    tpu.vector_store %arg12[%61, %c0_23, %c0_24], %64 {strides = array<i32>} : memref<10x8x32xf32, #tpu.memory_space<vmem>>, vector<1x8x32xf32>,
    %c2_i32 = arith.constant 2 : i32
    %65 = arith.index_cast %c2_i32 : i32 to index
    %c0_25 = arith.constant 0 : index
    %c0_26 = arith.constant 0 : index
    %66 = vector.load %arg11[%65, %c0_25, %c0_26] : memref<10x8x128xf32, #tpu.memory_space<vmem>>, vector<1x8x128xf32>
    %67 = vector.shape_cast %66 : vector<1x8x128xf32> to vector<8x128xf32>
    %68 = arith.truncf %60 : vector<8x32xf32> to vector<8x32xbf16>
    %cst_27 = arith.constant dense<0.000000e+00> : vector<8x128xf32>
    %69 = tpu.matmul %68, %1, %cst_27 {dimension_numbers = #tpu.dot_dimension_numbers<[1], [0], [0], [1], [0, 0, 1, 1], [], []>} : vector<8x32xbf16>, vector<32x128xbf16>, vector<8x128xf32> -> vector<8x128xf32>
    %70 = arith.addf %67, %69 : vector<8x128xf32>
    %71 = vector.extract_strided_slice %70 {offsets = [0, 0], sizes = [8, 96], strides = [1, 1]} : vector<8x128xf32> to vector<8x96xf32>
    %72 = arith.negf %71 : vector<8x96xf32>
    %73 = math.exp %72 : vector<8x96xf32>
    %cst_28 = arith.constant 1.000000e+00 : f32
    %74 = vector.broadcast %cst_28 : f32 to vector<8x96xf32>
    %75 = arith.addf %74, %73 : vector<8x96xf32>
    %76 = arith.divf %74, %75 : vector<8x96xf32>
    %77 = vector.extract_strided_slice %70 {offsets = [0, 96], sizes = [8, 32], strides = [1, 1]} : vector<8x128xf32> to vector<8x32xf32>
    %78 = math.tanh %77 : vector<8x32xf32>
    %79 = vector.extract_strided_slice %76 {offsets = [0, 0], sizes = [8, 32], strides = [1, 1]} : vector<8x96xf32> to vector<8x32xf32>
    %80 = vector.extract_strided_slice %76 {offsets = [0, 32], sizes = [8, 32], strides = [1, 1]} : vector<8x96xf32> to vector<8x32xf32>
    %81 = vector.extract_strided_slice %76 {offsets = [0, 64], sizes = [8, 32], strides = [1, 1]} : vector<8x96xf32> to vector<8x32xf32>
    %82 = arith.mulf %80, %58 : vector<8x32xf32>
    %83 = arith.mulf %79, %78 : vector<8x32xf32>
    %84 = arith.addf %82, %83 : vector<8x32xf32>
    %85 = math.tanh %84 : vector<8x32xf32>
    %86 = arith.mulf %81, %85 : vector<8x32xf32>
    %87 = arith.index_cast %c2_i32 : i32 to index
    %c0_29 = arith.constant 0 : index
    %c0_30 = arith.constant 0 : index
    %88 = vector.load %arg12[%87, %c0_29, %c0_30] : memref<10x8x32xf32, #tpu.memory_space<vmem>>, vector<1x8x32xf32>
    %89 = vector.shape_cast %88 : vector<1x8x32xf32> to vector<8x32xf32>
    %90 = vector.shape_cast %86 : vector<8x32xf32> to vector<1x8x32xf32>
    tpu.vector_store %arg12[%87, %c0_29, %c0_30], %90 {strides = array<i32>} : memref<10x8x32xf32, #tpu.memory_space<vmem>>, vector<1x8x32xf32>,
    %c3_i32 = arith.constant 3 : i32
    %91 = arith.index_cast %c3_i32 : i32 to index
    %c0_31 = arith.constant 0 : index
    %c0_32 = arith.constant 0 : index
    %92 = vector.load %arg11[%91, %c0_31, %c0_32] : memref<10x8x128xf32, #tpu.memory_space<vmem>>, vector<1x8x128xf32>
    %93 = vector.shape_cast %92 : vector<1x8x128xf32> to vector<8x128xf32>
    %94 = arith.truncf %86 : vector<8x32xf32> to vector<8x32xbf16>
    %cst_33 = arith.constant dense<0.000000e+00> : vector<8x128xf32>
    %95 = tpu.matmul %94, %1, %cst_33 {dimension_numbers = #tpu.dot_dimension_numbers<[1], [0], [0], [1], [0, 0, 1, 1], [], []>} : vector<8x32xbf16>, vector<32x128xbf16>, vector<8x128xf32> -> vector<8x128xf32>
    %96 = arith.addf %93, %95 : vector<8x128xf32>
    %97 = vector.extract_strided_slice %96 {offsets = [0, 0], sizes = [8, 96], strides = [1, 1]} : vector<8x128xf32> to vector<8x96xf32>
    %98 = arith.negf %97 : vector<8x96xf32>
    %99 = math.exp %98 : vector<8x96xf32>
    %cst_34 = arith.constant 1.000000e+00 : f32
    %100 = vector.broadcast %cst_34 : f32 to vector<8x96xf32>
    %101 = arith.addf %100, %99 : vector<8x96xf32>
    %102 = arith.divf %100, %101 : vector<8x96xf32>
    %103 = vector.extract_strided_slice %96 {offsets = [0, 96], sizes = [8, 32], strides = [1, 1]} : vector<8x128xf32> to vector<8x32xf32>
    %104 = math.tanh %103 : vector<8x32xf32>
    %105 = vector.extract_strided_slice %102 {offsets = [0, 0], sizes = [8, 32], strides = [1, 1]} : vector<8x96xf32> to vector<8x32xf32>
    %106 = vector.extract_strided_slice %102 {offsets = [0, 32], sizes = [8, 32], strides = [1, 1]} : vector<8x96xf32> to vector<8x32xf32>
    %107 = vector.extract_strided_slice %102 {offsets = [0, 64], sizes = [8, 32], strides = [1, 1]} : vector<8x96xf32> to vector<8x32xf32>
    %108 = arith.mulf %106, %84 : vector<8x32xf32>
    %109 = arith.mulf %105, %104 : vector<8x32xf32>
    %110 = arith.addf %108, %109 : vector<8x32xf32>
    %111 = math.tanh %110 : vector<8x32xf32>
    %112 = arith.mulf %107, %111 : vector<8x32xf32>
    %113 = arith.index_cast %c3_i32 : i32 to index
    %c0_35 = arith.constant 0 : index
    %c0_36 = arith.constant 0 : index
    %114 = vector.load %arg12[%113, %c0_35, %c0_36] : memref<10x8x32xf32, #tpu.memory_space<vmem>>, vector<1x8x32xf32>
    %115 = vector.shape_cast %114 : vector<1x8x32xf32> to vector<8x32xf32>
    %116 = vector.shape_cast %112 : vector<8x32xf32> to vector<1x8x32xf32>
    tpu.vector_store %arg12[%113, %c0_35, %c0_36], %116 {strides = array<i32>} : memref<10x8x32xf32, #tpu.memory_space<vmem>>, vector<1x8x32xf32>,
    %c4_i32 = arith.constant 4 : i32
    %117 = arith.index_cast %c4_i32 : i32 to index
    %c0_37 = arith.constant 0 : index
    %c0_38 = arith.constant 0 : index
    %118 = vector.load %arg11[%117, %c0_37, %c0_38] : memref<10x8x128xf32, #tpu.memory_space<vmem>>, vector<1x8x128xf32>
    %119 = vector.shape_cast %118 : vector<1x8x128xf32> to vector<8x128xf32>
    %120 = arith.truncf %112 : vector<8x32xf32> to vector<8x32xbf16>
    %cst_39 = arith.constant dense<0.000000e+00> : vector<8x128xf32>
    %121 = tpu.matmul %120, %1, %cst_39 {dimension_numbers = #tpu.dot_dimension_numbers<[1], [0], [0], [1], [0, 0, 1, 1], [], []>} : vector<8x32xbf16>, vector<32x128xbf16>, vector<8x128xf32> -> vector<8x128xf32>
    %122 = arith.addf %119, %121 : vector<8x128xf32>
    %123 = vector.extract_strided_slice %122 {offsets = [0, 0], sizes = [8, 96], strides = [1, 1]} : vector<8x128xf32> to vector<8x96xf32>
    %124 = arith.negf %123 : vector<8x96xf32>
    %125 = math.exp %124 : vector<8x96xf32>
    %cst_40 = arith.constant 1.000000e+00 : f32
    %126 = vector.broadcast %cst_40 : f32 to vector<8x96xf32>
    %127 = arith.addf %126, %125 : vector<8x96xf32>
    %128 = arith.divf %126, %127 : vector<8x96xf32>
    %129 = vector.extract_strided_slice %122 {offsets = [0, 96], sizes = [8, 32], strides = [1, 1]} : vector<8x128xf32> to vector<8x32xf32>
    %130 = math.tanh %129 : vector<8x32xf32>
    %131 = vector.extract_strided_slice %128 {offsets = [0, 0], sizes = [8, 32], strides = [1, 1]} : vector<8x96xf32> to vector<8x32xf32>
    %132 = vector.extract_strided_slice %128 {offsets = [0, 32], sizes = [8, 32], strides = [1, 1]} : vector<8x96xf32> to vector<8x32xf32>
    %133 = vector.extract_strided_slice %128 {offsets = [0, 64], sizes = [8, 32], strides = [1, 1]} : vector<8x96xf32> to vector<8x32xf32>
    %134 = arith.mulf %132, %110 : vector<8x32xf32>
    %135 = arith.mulf %131, %130 : vector<8x32xf32>
    %136 = arith.addf %134, %135 : vector<8x32xf32>
    %137 = math.tanh %136 : vector<8x32xf32>
    %138 = arith.mulf %133, %137 : vector<8x32xf32>
    %139 = arith.index_cast %c4_i32 : i32 to index
    %c0_41 = arith.constant 0 : index
    %c0_42 = arith.constant 0 : index
    %140 = vector.load %arg12[%139, %c0_41, %c0_42] : memref<10x8x32xf32, #tpu.memory_space<vmem>>, vector<1x8x32xf32>
    %141 = vector.shape_cast %140 : vector<1x8x32xf32> to vector<8x32xf32>
    %142 = vector.shape_cast %138 : vector<8x32xf32> to vector<1x8x32xf32>
    tpu.vector_store %arg12[%139, %c0_41, %c0_42], %142 {strides = array<i32>} : memref<10x8x32xf32, #tpu.memory_space<vmem>>, vector<1x8x32xf32>,
    %c5_i32 = arith.constant 5 : i32
    %143 = arith.index_cast %c5_i32 : i32 to index
    %c0_43 = arith.constant 0 : index
    %c0_44 = arith.constant 0 : index
    %144 = vector.load %arg11[%143, %c0_43, %c0_44] : memref<10x8x128xf32, #tpu.memory_space<vmem>>, vector<1x8x128xf32>
    %145 = vector.shape_cast %144 : vector<1x8x128xf32> to vector<8x128xf32>
    %146 = arith.truncf %138 : vector<8x32xf32> to vector<8x32xbf16>
    %cst_45 = arith.constant dense<0.000000e+00> : vector<8x128xf32>
    %147 = tpu.matmul %146, %1, %cst_45 {dimension_numbers = #tpu.dot_dimension_numbers<[1], [0], [0], [1], [0, 0, 1, 1], [], []>} : vector<8x32xbf16>, vector<32x128xbf16>, vector<8x128xf32> -> vector<8x128xf32>
    %148 = arith.addf %145, %147 : vector<8x128xf32>
    %149 = vector.extract_strided_slice %148 {offsets = [0, 0], sizes = [8, 96], strides = [1, 1]} : vector<8x128xf32> to vector<8x96xf32>
    %150 = arith.negf %149 : vector<8x96xf32>
    %151 = math.exp %150 : vector<8x96xf32>
    %cst_46 = arith.constant 1.000000e+00 : f32
    %152 = vector.broadcast %cst_46 : f32 to vector<8x96xf32>
    %153 = arith.addf %152, %151 : vector<8x96xf32>
    %154 = arith.divf %152, %153 : vector<8x96xf32>
    %155 = vector.extract_strided_slice %148 {offsets = [0, 96], sizes = [8, 32], strides = [1, 1]} : vector<8x128xf32> to vector<8x32xf32>
    %156 = math.tanh %155 : vector<8x32xf32>
    %157 = vector.extract_strided_slice %154 {offsets = [0, 0], sizes = [8, 32], strides = [1, 1]} : vector<8x96xf32> to vector<8x32xf32>
    %158 = vector.extract_strided_slice %154 {offsets = [0, 32], sizes = [8, 32], strides = [1, 1]} : vector<8x96xf32> to vector<8x32xf32>
    %159 = vector.extract_strided_slice %154 {offsets = [0, 64], sizes = [8, 32], strides = [1, 1]} : vector<8x96xf32> to vector<8x32xf32>
    %160 = arith.mulf %158, %136 : vector<8x32xf32>
    %161 = arith.mulf %157, %156 : vector<8x32xf32>
    %162 = arith.addf %160, %161 : vector<8x32xf32>
    %163 = math.tanh %162 : vector<8x32xf32>
    %164 = arith.mulf %159, %163 : vector<8x32xf32>
    %165 = arith.index_cast %c5_i32 : i32 to index
    %c0_47 = arith.constant 0 : index
    %c0_48 = arith.constant 0 : index
    %166 = vector.load %arg12[%165, %c0_47, %c0_48] : memref<10x8x32xf32, #tpu.memory_space<vmem>>, vector<1x8x32xf32>
    %167 = vector.shape_cast %166 : vector<1x8x32xf32> to vector<8x32xf32>
    %168 = vector.shape_cast %164 : vector<8x32xf32> to vector<1x8x32xf32>
    tpu.vector_store %arg12[%165, %c0_47, %c0_48], %168 {strides = array<i32>} : memref<10x8x32xf32, #tpu.memory_space<vmem>>, vector<1x8x32xf32>,
    %c6_i32 = arith.constant 6 : i32
    %169 = arith.index_cast %c6_i32 : i32 to index
    %c0_49 = arith.constant 0 : index
    %c0_50 = arith.constant 0 : index
    %170 = vector.load %arg11[%169, %c0_49, %c0_50] : memref<10x8x128xf32, #tpu.memory_space<vmem>>, vector<1x8x128xf32>
    %171 = vector.shape_cast %170 : vector<1x8x128xf32> to vector<8x128xf32>
    %172 = arith.truncf %164 : vector<8x32xf32> to vector<8x32xbf16>
    %cst_51 = arith.constant dense<0.000000e+00> : vector<8x128xf32>
    %173 = tpu.matmul %172, %1, %cst_51 {dimension_numbers = #tpu.dot_dimension_numbers<[1], [0], [0], [1], [0, 0, 1, 1], [], []>} : vector<8x32xbf16>, vector<32x128xbf16>, vector<8x128xf32> -> vector<8x128xf32>
    %174 = arith.addf %171, %173 : vector<8x128xf32>
    %175 = vector.extract_strided_slice %174 {offsets = [0, 0], sizes = [8, 96], strides = [1, 1]} : vector<8x128xf32> to vector<8x96xf32>
    %176 = arith.negf %175 : vector<8x96xf32>
    %177 = math.exp %176 : vector<8x96xf32>
    %cst_52 = arith.constant 1.000000e+00 : f32
    %178 = vector.broadcast %cst_52 : f32 to vector<8x96xf32>
    %179 = arith.addf %178, %177 : vector<8x96xf32>
    %180 = arith.divf %178, %179 : vector<8x96xf32>
    %181 = vector.extract_strided_slice %174 {offsets = [0, 96], sizes = [8, 32], strides = [1, 1]} : vector<8x128xf32> to vector<8x32xf32>
    %182 = math.tanh %181 : vector<8x32xf32>
    %183 = vector.extract_strided_slice %180 {offsets = [0, 0], sizes = [8, 32], strides = [1, 1]} : vector<8x96xf32> to vector<8x32xf32>
    %184 = vector.extract_strided_slice %180 {offsets = [0, 32], sizes = [8, 32], strides = [1, 1]} : vector<8x96xf32> to vector<8x32xf32>
    %185 = vector.extract_strided_slice %180 {offsets = [0, 64], sizes = [8, 32], strides = [1, 1]} : vector<8x96xf32> to vector<8x32xf32>
    %186 = arith.mulf %184, %162 : vector<8x32xf32>
    %187 = arith.mulf %183, %182 : vector<8x32xf32>
    %188 = arith.addf %186, %187 : vector<8x32xf32>
    %189 = math.tanh %188 : vector<8x32xf32>
    %190 = arith.mulf %185, %189 : vector<8x32xf32>
    %191 = arith.index_cast %c6_i32 : i32 to index
    %c0_53 = arith.constant 0 : index
    %c0_54 = arith.constant 0 : index
    %192 = vector.load %arg12[%191, %c0_53, %c0_54] : memref<10x8x32xf32, #tpu.memory_space<vmem>>, vector<1x8x32xf32>
    %193 = vector.shape_cast %192 : vector<1x8x32xf32> to vector<8x32xf32>
    %194 = vector.shape_cast %190 : vector<8x32xf32> to vector<1x8x32xf32>
    tpu.vector_store %arg12[%191, %c0_53, %c0_54], %194 {strides = array<i32>} : memref<10x8x32xf32, #tpu.memory_space<vmem>>, vector<1x8x32xf32>,
    %c7_i32 = arith.constant 7 : i32
    %195 = arith.index_cast %c7_i32 : i32 to index
    %c0_55 = arith.constant 0 : index
    %c0_56 = arith.constant 0 : index
    %196 = vector.load %arg11[%195, %c0_55, %c0_56] : memref<10x8x128xf32, #tpu.memory_space<vmem>>, vector<1x8x128xf32>
    %197 = vector.shape_cast %196 : vector<1x8x128xf32> to vector<8x128xf32>
    %198 = arith.truncf %190 : vector<8x32xf32> to vector<8x32xbf16>
    %cst_57 = arith.constant dense<0.000000e+00> : vector<8x128xf32>
    %199 = tpu.matmul %198, %1, %cst_57 {dimension_numbers = #tpu.dot_dimension_numbers<[1], [0], [0], [1], [0, 0, 1, 1], [], []>} : vector<8x32xbf16>, vector<32x128xbf16>, vector<8x128xf32> -> vector<8x128xf32>
    %200 = arith.addf %197, %199 : vector<8x128xf32>
    %201 = vector.extract_strided_slice %200 {offsets = [0, 0], sizes = [8, 96], strides = [1, 1]} : vector<8x128xf32> to vector<8x96xf32>
    %202 = arith.negf %201 : vector<8x96xf32>
    %203 = math.exp %202 : vector<8x96xf32>
    %cst_58 = arith.constant 1.000000e+00 : f32
    %204 = vector.broadcast %cst_58 : f32 to vector<8x96xf32>
    %205 = arith.addf %204, %203 : vector<8x96xf32>
    %206 = arith.divf %204, %205 : vector<8x96xf32>
    %207 = vector.extract_strided_slice %200 {offsets = [0, 96], sizes = [8, 32], strides = [1, 1]} : vector<8x128xf32> to vector<8x32xf32>
    %208 = math.tanh %207 : vector<8x32xf32>
    %209 = vector.extract_strided_slice %206 {offsets = [0, 0], sizes = [8, 32], strides = [1, 1]} : vector<8x96xf32> to vector<8x32xf32>
    %210 = vector.extract_strided_slice %206 {offsets = [0, 32], sizes = [8, 32], strides = [1, 1]} : vector<8x96xf32> to vector<8x32xf32>
    %211 = vector.extract_strided_slice %206 {offsets = [0, 64], sizes = [8, 32], strides = [1, 1]} : vector<8x96xf32> to vector<8x32xf32>
    %212 = arith.mulf %210, %188 : vector<8x32xf32>
    %213 = arith.mulf %209, %208 : vector<8x32xf32>
    %214 = arith.addf %212, %213 : vector<8x32xf32>
    %215 = math.tanh %214 : vector<8x32xf32>
    %216 = arith.mulf %211, %215 : vector<8x32xf32>
    %217 = arith.index_cast %c7_i32 : i32 to index
    %c0_59 = arith.constant 0 : index
    %c0_60 = arith.constant 0 : index
    %218 = vector.load %arg12[%217, %c0_59, %c0_60] : memref<10x8x32xf32, #tpu.memory_space<vmem>>, vector<1x8x32xf32>
    %219 = vector.shape_cast %218 : vector<1x8x32xf32> to vector<8x32xf32>
    %220 = vector.shape_cast %216 : vector<8x32xf32> to vector<1x8x32xf32>
    tpu.vector_store %arg12[%217, %c0_59, %c0_60], %220 {strides = array<i32>} : memref<10x8x32xf32, #tpu.memory_space<vmem>>, vector<1x8x32xf32>,
    %c8_i32 = arith.constant 8 : i32
    %221 = arith.index_cast %c8_i32 : i32 to index
    %c0_61 = arith.constant 0 : index
    %c0_62 = arith.constant 0 : index
    %222 = vector.load %arg11[%221, %c0_61, %c0_62] : memref<10x8x128xf32, #tpu.memory_space<vmem>>, vector<1x8x128xf32>
    %223 = vector.shape_cast %222 : vector<1x8x128xf32> to vector<8x128xf32>
    %224 = arith.truncf %216 : vector<8x32xf32> to vector<8x32xbf16>
    %cst_63 = arith.constant dense<0.000000e+00> : vector<8x128xf32>
    %225 = tpu.matmul %224, %1, %cst_63 {dimension_numbers = #tpu.dot_dimension_numbers<[1], [0], [0], [1], [0, 0, 1, 1], [], []>} : vector<8x32xbf16>, vector<32x128xbf16>, vector<8x128xf32> -> vector<8x128xf32>
    %226 = arith.addf %223, %225 : vector<8x128xf32>
    %227 = vector.extract_strided_slice %226 {offsets = [0, 0], sizes = [8, 96], strides = [1, 1]} : vector<8x128xf32> to vector<8x96xf32>
    %228 = arith.negf %227 : vector<8x96xf32>
    %229 = math.exp %228 : vector<8x96xf32>
    %cst_64 = arith.constant 1.000000e+00 : f32
    %230 = vector.broadcast %cst_64 : f32 to vector<8x96xf32>
    %231 = arith.addf %230, %229 : vector<8x96xf32>
    %232 = arith.divf %230, %231 : vector<8x96xf32>
    %233 = vector.extract_strided_slice %226 {offsets = [0, 96], sizes = [8, 32], strides = [1, 1]} : vector<8x128xf32> to vector<8x32xf32>
    %234 = math.tanh %233 : vector<8x32xf32>
    %235 = vector.extract_strided_slice %232 {offsets = [0, 0], sizes = [8, 32], strides = [1, 1]} : vector<8x96xf32> to vector<8x32xf32>
    %236 = vector.extract_strided_slice %232 {offsets = [0, 32], sizes = [8, 32], strides = [1, 1]} : vector<8x96xf32> to vector<8x32xf32>
    %237 = vector.extract_strided_slice %232 {offsets = [0, 64], sizes = [8, 32], strides = [1, 1]} : vector<8x96xf32> to vector<8x32xf32>
    %238 = arith.mulf %236, %214 : vector<8x32xf32>
    %239 = arith.mulf %235, %234 : vector<8x32xf32>
    %240 = arith.addf %238, %239 : vector<8x32xf32>
    %241 = math.tanh %240 : vector<8x32xf32>
    %242 = arith.mulf %237, %241 : vector<8x32xf32>
    %243 = arith.index_cast %c8_i32 : i32 to index
    %c0_65 = arith.constant 0 : index
    %c0_66 = arith.constant 0 : index
    %244 = vector.load %arg12[%243, %c0_65, %c0_66] : memref<10x8x32xf32, #tpu.memory_space<vmem>>, vector<1x8x32xf32>
    %245 = vector.shape_cast %244 : vector<1x8x32xf32> to vector<8x32xf32>
    %246 = vector.shape_cast %242 : vector<8x32xf32> to vector<1x8x32xf32>
    tpu.vector_store %arg12[%243, %c0_65, %c0_66], %246 {strides = array<i32>} : memref<10x8x32xf32, #tpu.memory_space<vmem>>, vector<1x8x32xf32>,
    %c9_i32 = arith.constant 9 : i32
    %247 = arith.index_cast %c9_i32 : i32 to index
    %c0_67 = arith.constant 0 : index
    %c0_68 = arith.constant 0 : index
    %248 = vector.load %arg11[%247, %c0_67, %c0_68] : memref<10x8x128xf32, #tpu.memory_space<vmem>>, vector<1x8x128xf32>
    %249 = vector.shape_cast %248 : vector<1x8x128xf32> to vector<8x128xf32>
    %250 = arith.truncf %242 : vector<8x32xf32> to vector<8x32xbf16>
    %cst_69 = arith.constant dense<0.000000e+00> : vector<8x128xf32>
    %251 = tpu.matmul %250, %1, %cst_69 {dimension_numbers = #tpu.dot_dimension_numbers<[1], [0], [0], [1], [0, 0, 1, 1], [], []>} : vector<8x32xbf16>, vector<32x128xbf16>, vector<8x128xf32> -> vector<8x128xf32>
    %252 = arith.addf %249, %251 : vector<8x128xf32>
    %253 = vector.extract_strided_slice %252 {offsets = [0, 0], sizes = [8, 96], strides = [1, 1]} : vector<8x128xf32> to vector<8x96xf32>
    %254 = arith.negf %253 : vector<8x96xf32>
    %255 = math.exp %254 : vector<8x96xf32>
    %cst_70 = arith.constant 1.000000e+00 : f32
    %256 = vector.broadcast %cst_70 : f32 to vector<8x96xf32>
    %257 = arith.addf %256, %255 : vector<8x96xf32>
    %258 = arith.divf %256, %257 : vector<8x96xf32>
    %259 = vector.extract_strided_slice %252 {offsets = [0, 96], sizes = [8, 32], strides = [1, 1]} : vector<8x128xf32> to vector<8x32xf32>
    %260 = math.tanh %259 : vector<8x32xf32>
    %261 = vector.extract_strided_slice %258 {offsets = [0, 0], sizes = [8, 32], strides = [1, 1]} : vector<8x96xf32> to vector<8x32xf32>
    %262 = vector.extract_strided_slice %258 {offsets = [0, 32], sizes = [8, 32], strides = [1, 1]} : vector<8x96xf32> to vector<8x32xf32>
    %263 = vector.extract_strided_slice %258 {offsets = [0, 64], sizes = [8, 32], strides = [1, 1]} : vector<8x96xf32> to vector<8x32xf32>
    %264 = arith.mulf %262, %240 : vector<8x32xf32>
    %265 = arith.mulf %261, %260 : vector<8x32xf32>
    %266 = arith.addf %264, %265 : vector<8x32xf32>
    %267 = math.tanh %266 : vector<8x32xf32>
    %268 = arith.mulf %263, %267 : vector<8x32xf32>
    %269 = arith.index_cast %c9_i32 : i32 to index
    %c0_71 = arith.constant 0 : index
    %c0_72 = arith.constant 0 : index
    %270 = vector.load %arg12[%269, %c0_71, %c0_72] : memref<10x8x32xf32, #tpu.memory_space<vmem>>, vector<1x8x32xf32>
    %271 = vector.shape_cast %270 : vector<1x8x32xf32> to vector<8x32xf32>
    %272 = vector.shape_cast %268 : vector<8x32xf32> to vector<1x8x32xf32>
    tpu.vector_store %arg12[%269, %c0_71, %c0_72], %272 {strides = array<i32>} : memref<10x8x32xf32, #tpu.memory_space<vmem>>, vector<1x8x32xf32>,
    %c10_i32 = arith.constant 10 : i32
    %c0_73 = arith.constant 0 : index
    %c0_74 = arith.constant 0 : index
    %273 = vector.load %arg5[%c0_73, %c0_74] : memref<32x128xbf16, #tpu.memory_space<vmem>>, vector<32x128xbf16>
    %c0_75 = arith.constant 0 : index
    %c0_76 = arith.constant 0 : index
    %274 = vector.load %arg6[%c0_75, %c0_76] : memref<32x128xbf16, #tpu.memory_space<vmem>>, vector<32x128xbf16>
    %c0_77 = arith.constant 0 : index
    %c0_78 = arith.constant 0 : index
    %275 = vector.load %arg7[%c0_77, %c0_78] : memref<1x128xf32, #tpu.memory_space<vmem>>, vector<1x128xf32>
    %c0_79 = arith.constant 0 : index
    %c0_80 = arith.constant 0 : index
    %c0_81 = arith.constant 0 : index
    %276 = vector.load %arg12[%c0_79, %c0_80, %c0_81] : memref<10x8x32xf32, #tpu.memory_space<vmem>>, vector<10x8x32xf32>
    %277 = vector.shape_cast %276 : vector<10x8x32xf32> to vector<80x32xf32>
    %278 = arith.truncf %277 : vector<80x32xf32> to vector<80x32xbf16>
    %cst_82 = arith.constant dense<0.000000e+00> : vector<80x128xf32>
    %279 = tpu.matmul %278, %273, %cst_82 {dimension_numbers = #tpu.dot_dimension_numbers<[1], [0], [0], [1], [0, 0, 1, 1], [], []>} : vector<80x32xbf16>, vector<32x128xbf16>, vector<80x128xf32> -> vector<80x128xf32>
    %280 = vector.broadcast %275 : vector<1x128xf32> to vector<80x128xf32>
    %281 = arith.addf %279, %280 : vector<80x128xf32>
    %282 = vector.shape_cast %281 : vector<80x128xf32> to vector<10x8x128xf32>
    %c0_83 = arith.constant 0 : index
    %c0_84 = arith.constant 0 : index
    %c0_85 = arith.constant 0 : index
    %283 = vector.load %arg11[%c0_83, %c0_84, %c0_85] : memref<10x8x128xf32, #tpu.memory_space<vmem>>, vector<10x8x128xf32>
    tpu.vector_store %arg11[%c0_83, %c0_84, %c0_85], %282 {strides = array<i32>} : memref<10x8x128xf32, #tpu.memory_space<vmem>>, vector<10x8x128xf32>,
    %cst_86 = arith.constant 0.000000e+00 : f32
    %284 = vector.broadcast %cst_86 : f32 to vector<8x32xf32>
    %cst_87 = arith.constant 0.000000e+00 : f32
    %285 = vector.broadcast %cst_87 : f32 to vector<8x32xf32>
    %c0_i32_88 = arith.constant 0 : i32
    %286 = arith.index_cast %c0_i32_88 : i32 to index
    %c0_89 = arith.constant 0 : index
    %c0_90 = arith.constant 0 : index
    %287 = vector.load %arg11[%286, %c0_89, %c0_90] : memref<10x8x128xf32, #tpu.memory_space<vmem>>, vector<1x8x128xf32>
    %288 = vector.shape_cast %287 : vector<1x8x128xf32> to vector<8x128xf32>
    %289 = arith.truncf %284 : vector<8x32xf32> to vector<8x32xbf16>
    %cst_91 = arith.constant dense<0.000000e+00> : vector<8x128xf32>
    %290 = tpu.matmul %289, %274, %cst_91 {dimension_numbers = #tpu.dot_dimension_numbers<[1], [0], [0], [1], [0, 0, 1, 1], [], []>} : vector<8x32xbf16>, vector<32x128xbf16>, vector<8x128xf32> -> vector<8x128xf32>
    %291 = arith.addf %288, %290 : vector<8x128xf32>
    %292 = vector.extract_strided_slice %291 {offsets = [0, 0], sizes = [8, 96], strides = [1, 1]} : vector<8x128xf32> to vector<8x96xf32>
    %293 = arith.negf %292 : vector<8x96xf32>
    %294 = math.exp %293 : vector<8x96xf32>
    %cst_92 = arith.constant 1.000000e+00 : f32
    %295 = vector.broadcast %cst_92 : f32 to vector<8x96xf32>
    %296 = arith.addf %295, %294 : vector<8x96xf32>
    %297 = arith.divf %295, %296 : vector<8x96xf32>
    %298 = vector.extract_strided_slice %291 {offsets = [0, 96], sizes = [8, 32], strides = [1, 1]} : vector<8x128xf32> to vector<8x32xf32>
    %299 = math.tanh %298 : vector<8x32xf32>
    %300 = vector.extract_strided_slice %297 {offsets = [0, 0], sizes = [8, 32], strides = [1, 1]} : vector<8x96xf32> to vector<8x32xf32>
    %301 = vector.extract_strided_slice %297 {offsets = [0, 32], sizes = [8, 32], strides = [1, 1]} : vector<8x96xf32> to vector<8x32xf32>
    %302 = vector.extract_strided_slice %297 {offsets = [0, 64], sizes = [8, 32], strides = [1, 1]} : vector<8x96xf32> to vector<8x32xf32>
    %303 = arith.mulf %301, %285 : vector<8x32xf32>
    %304 = arith.mulf %300, %299 : vector<8x32xf32>
    %305 = arith.addf %303, %304 : vector<8x32xf32>
    %306 = math.tanh %305 : vector<8x32xf32>
    %307 = arith.mulf %302, %306 : vector<8x32xf32>
    %c1_i32_93 = arith.constant 1 : i32
    %308 = arith.index_cast %c1_i32_93 : i32 to index
    %c0_94 = arith.constant 0 : index
    %c0_95 = arith.constant 0 : index
    %309 = vector.load %arg11[%308, %c0_94, %c0_95] : memref<10x8x128xf32, #tpu.memory_space<vmem>>, vector<1x8x128xf32>
    %310 = vector.shape_cast %309 : vector<1x8x128xf32> to vector<8x128xf32>
    %311 = arith.truncf %307 : vector<8x32xf32> to vector<8x32xbf16>
    %cst_96 = arith.constant dense<0.000000e+00> : vector<8x128xf32>
    %312 = tpu.matmul %311, %274, %cst_96 {dimension_numbers = #tpu.dot_dimension_numbers<[1], [0], [0], [1], [0, 0, 1, 1], [], []>} : vector<8x32xbf16>, vector<32x128xbf16>, vector<8x128xf32> -> vector<8x128xf32>
    %313 = arith.addf %310, %312 : vector<8x128xf32>
    %314 = vector.extract_strided_slice %313 {offsets = [0, 0], sizes = [8, 96], strides = [1, 1]} : vector<8x128xf32> to vector<8x96xf32>
    %315 = arith.negf %314 : vector<8x96xf32>
    %316 = math.exp %315 : vector<8x96xf32>
    %cst_97 = arith.constant 1.000000e+00 : f32
    %317 = vector.broadcast %cst_97 : f32 to vector<8x96xf32>
    %318 = arith.addf %317, %316 : vector<8x96xf32>
    %319 = arith.divf %317, %318 : vector<8x96xf32>
    %320 = vector.extract_strided_slice %313 {offsets = [0, 96], sizes = [8, 32], strides = [1, 1]} : vector<8x128xf32> to vector<8x32xf32>
    %321 = math.tanh %320 : vector<8x32xf32>
    %322 = vector.extract_strided_slice %319 {offsets = [0, 0], sizes = [8, 32], strides = [1, 1]} : vector<8x96xf32> to vector<8x32xf32>
    %323 = vector.extract_strided_slice %319 {offsets = [0, 32], sizes = [8, 32], strides = [1, 1]} : vector<8x96xf32> to vector<8x32xf32>
    %324 = vector.extract_strided_slice %319 {offsets = [0, 64], sizes = [8, 32], strides = [1, 1]} : vector<8x96xf32> to vector<8x32xf32>
    %325 = arith.mulf %323, %305 : vector<8x32xf32>
    %326 = arith.mulf %322, %321 : vector<8x32xf32>
    %327 = arith.addf %325, %326 : vector<8x32xf32>
    %328 = math.tanh %327 : vector<8x32xf32>
    %329 = arith.mulf %324, %328 : vector<8x32xf32>
    %c2_i32_98 = arith.constant 2 : i32
    %330 = arith.index_cast %c2_i32_98 : i32 to index
    %c0_99 = arith.constant 0 : index
    %c0_100 = arith.constant 0 : index
    %331 = vector.load %arg11[%330, %c0_99, %c0_100] : memref<10x8x128xf32, #tpu.memory_space<vmem>>, vector<1x8x128xf32>
    %332 = vector.shape_cast %331 : vector<1x8x128xf32> to vector<8x128xf32>
    %333 = arith.truncf %329 : vector<8x32xf32> to vector<8x32xbf16>
    %cst_101 = arith.constant dense<0.000000e+00> : vector<8x128xf32>
    %334 = tpu.matmul %333, %274, %cst_101 {dimension_numbers = #tpu.dot_dimension_numbers<[1], [0], [0], [1], [0, 0, 1, 1], [], []>} : vector<8x32xbf16>, vector<32x128xbf16>, vector<8x128xf32> -> vector<8x128xf32>
    %335 = arith.addf %332, %334 : vector<8x128xf32>
    %336 = vector.extract_strided_slice %335 {offsets = [0, 0], sizes = [8, 96], strides = [1, 1]} : vector<8x128xf32> to vector<8x96xf32>
    %337 = arith.negf %336 : vector<8x96xf32>
    %338 = math.exp %337 : vector<8x96xf32>
    %cst_102 = arith.constant 1.000000e+00 : f32
    %339 = vector.broadcast %cst_102 : f32 to vector<8x96xf32>
    %340 = arith.addf %339, %338 : vector<8x96xf32>
    %341 = arith.divf %339, %340 : vector<8x96xf32>
    %342 = vector.extract_strided_slice %335 {offsets = [0, 96], sizes = [8, 32], strides = [1, 1]} : vector<8x128xf32> to vector<8x32xf32>
    %343 = math.tanh %342 : vector<8x32xf32>
    %344 = vector.extract_strided_slice %341 {offsets = [0, 0], sizes = [8, 32], strides = [1, 1]} : vector<8x96xf32> to vector<8x32xf32>
    %345 = vector.extract_strided_slice %341 {offsets = [0, 32], sizes = [8, 32], strides = [1, 1]} : vector<8x96xf32> to vector<8x32xf32>
    %346 = vector.extract_strided_slice %341 {offsets = [0, 64], sizes = [8, 32], strides = [1, 1]} : vector<8x96xf32> to vector<8x32xf32>
    %347 = arith.mulf %345, %327 : vector<8x32xf32>
    %348 = arith.mulf %344, %343 : vector<8x32xf32>
    %349 = arith.addf %347, %348 : vector<8x32xf32>
    %350 = math.tanh %349 : vector<8x32xf32>
    %351 = arith.mulf %346, %350 : vector<8x32xf32>
    %c3_i32_103 = arith.constant 3 : i32
    %352 = arith.index_cast %c3_i32_103 : i32 to index
    %c0_104 = arith.constant 0 : index
    %c0_105 = arith.constant 0 : index
    %353 = vector.load %arg11[%352, %c0_104, %c0_105] : memref<10x8x128xf32, #tpu.memory_space<vmem>>, vector<1x8x128xf32>
    %354 = vector.shape_cast %353 : vector<1x8x128xf32> to vector<8x128xf32>
    %355 = arith.truncf %351 : vector<8x32xf32> to vector<8x32xbf16>
    %cst_106 = arith.constant dense<0.000000e+00> : vector<8x128xf32>
    %356 = tpu.matmul %355, %274, %cst_106 {dimension_numbers = #tpu.dot_dimension_numbers<[1], [0], [0], [1], [0, 0, 1, 1], [], []>} : vector<8x32xbf16>, vector<32x128xbf16>, vector<8x128xf32> -> vector<8x128xf32>
    %357 = arith.addf %354, %356 : vector<8x128xf32>
    %358 = vector.extract_strided_slice %357 {offsets = [0, 0], sizes = [8, 96], strides = [1, 1]} : vector<8x128xf32> to vector<8x96xf32>
    %359 = arith.negf %358 : vector<8x96xf32>
    %360 = math.exp %359 : vector<8x96xf32>
    %cst_107 = arith.constant 1.000000e+00 : f32
    %361 = vector.broadcast %cst_107 : f32 to vector<8x96xf32>
    %362 = arith.addf %361, %360 : vector<8x96xf32>
    %363 = arith.divf %361, %362 : vector<8x96xf32>
    %364 = vector.extract_strided_slice %357 {offsets = [0, 96], sizes = [8, 32], strides = [1, 1]} : vector<8x128xf32> to vector<8x32xf32>
    %365 = math.tanh %364 : vector<8x32xf32>
    %366 = vector.extract_strided_slice %363 {offsets = [0, 0], sizes = [8, 32], strides = [1, 1]} : vector<8x96xf32> to vector<8x32xf32>
    %367 = vector.extract_strided_slice %363 {offsets = [0, 32], sizes = [8, 32], strides = [1, 1]} : vector<8x96xf32> to vector<8x32xf32>
    %368 = vector.extract_strided_slice %363 {offsets = [0, 64], sizes = [8, 32], strides = [1, 1]} : vector<8x96xf32> to vector<8x32xf32>
    %369 = arith.mulf %367, %349 : vector<8x32xf32>
    %370 = arith.mulf %366, %365 : vector<8x32xf32>
    %371 = arith.addf %369, %370 : vector<8x32xf32>
    %372 = math.tanh %371 : vector<8x32xf32>
    %373 = arith.mulf %368, %372 : vector<8x32xf32>
    %c4_i32_108 = arith.constant 4 : i32
    %374 = arith.index_cast %c4_i32_108 : i32 to index
    %c0_109 = arith.constant 0 : index
    %c0_110 = arith.constant 0 : index
    %375 = vector.load %arg11[%374, %c0_109, %c0_110] : memref<10x8x128xf32, #tpu.memory_space<vmem>>, vector<1x8x128xf32>
    %376 = vector.shape_cast %375 : vector<1x8x128xf32> to vector<8x128xf32>
    %377 = arith.truncf %373 : vector<8x32xf32> to vector<8x32xbf16>
    %cst_111 = arith.constant dense<0.000000e+00> : vector<8x128xf32>
    %378 = tpu.matmul %377, %274, %cst_111 {dimension_numbers = #tpu.dot_dimension_numbers<[1], [0], [0], [1], [0, 0, 1, 1], [], []>} : vector<8x32xbf16>, vector<32x128xbf16>, vector<8x128xf32> -> vector<8x128xf32>
    %379 = arith.addf %376, %378 : vector<8x128xf32>
    %380 = vector.extract_strided_slice %379 {offsets = [0, 0], sizes = [8, 96], strides = [1, 1]} : vector<8x128xf32> to vector<8x96xf32>
    %381 = arith.negf %380 : vector<8x96xf32>
    %382 = math.exp %381 : vector<8x96xf32>
    %cst_112 = arith.constant 1.000000e+00 : f32
    %383 = vector.broadcast %cst_112 : f32 to vector<8x96xf32>
    %384 = arith.addf %383, %382 : vector<8x96xf32>
    %385 = arith.divf %383, %384 : vector<8x96xf32>
    %386 = vector.extract_strided_slice %379 {offsets = [0, 96], sizes = [8, 32], strides = [1, 1]} : vector<8x128xf32> to vector<8x32xf32>
    %387 = math.tanh %386 : vector<8x32xf32>
    %388 = vector.extract_strided_slice %385 {offsets = [0, 0], sizes = [8, 32], strides = [1, 1]} : vector<8x96xf32> to vector<8x32xf32>
    %389 = vector.extract_strided_slice %385 {offsets = [0, 32], sizes = [8, 32], strides = [1, 1]} : vector<8x96xf32> to vector<8x32xf32>
    %390 = vector.extract_strided_slice %385 {offsets = [0, 64], sizes = [8, 32], strides = [1, 1]} : vector<8x96xf32> to vector<8x32xf32>
    %391 = arith.mulf %389, %371 : vector<8x32xf32>
    %392 = arith.mulf %388, %387 : vector<8x32xf32>
    %393 = arith.addf %391, %392 : vector<8x32xf32>
    %394 = math.tanh %393 : vector<8x32xf32>
    %395 = arith.mulf %390, %394 : vector<8x32xf32>
    %c5_i32_113 = arith.constant 5 : i32
    %396 = arith.index_cast %c5_i32_113 : i32 to index
    %c0_114 = arith.constant 0 : index
    %c0_115 = arith.constant 0 : index
    %397 = vector.load %arg11[%396, %c0_114, %c0_115] : memref<10x8x128xf32, #tpu.memory_space<vmem>>, vector<1x8x128xf32>
    %398 = vector.shape_cast %397 : vector<1x8x128xf32> to vector<8x128xf32>
    %399 = arith.truncf %395 : vector<8x32xf32> to vector<8x32xbf16>
    %cst_116 = arith.constant dense<0.000000e+00> : vector<8x128xf32>
    %400 = tpu.matmul %399, %274, %cst_116 {dimension_numbers = #tpu.dot_dimension_numbers<[1], [0], [0], [1], [0, 0, 1, 1], [], []>} : vector<8x32xbf16>, vector<32x128xbf16>, vector<8x128xf32> -> vector<8x128xf32>
    %401 = arith.addf %398, %400 : vector<8x128xf32>
    %402 = vector.extract_strided_slice %401 {offsets = [0, 0], sizes = [8, 96], strides = [1, 1]} : vector<8x128xf32> to vector<8x96xf32>
    %403 = arith.negf %402 : vector<8x96xf32>
    %404 = math.exp %403 : vector<8x96xf32>
    %cst_117 = arith.constant 1.000000e+00 : f32
    %405 = vector.broadcast %cst_117 : f32 to vector<8x96xf32>
    %406 = arith.addf %405, %404 : vector<8x96xf32>
    %407 = arith.divf %405, %406 : vector<8x96xf32>
    %408 = vector.extract_strided_slice %401 {offsets = [0, 96], sizes = [8, 32], strides = [1, 1]} : vector<8x128xf32> to vector<8x32xf32>
    %409 = math.tanh %408 : vector<8x32xf32>
    %410 = vector.extract_strided_slice %407 {offsets = [0, 0], sizes = [8, 32], strides = [1, 1]} : vector<8x96xf32> to vector<8x32xf32>
    %411 = vector.extract_strided_slice %407 {offsets = [0, 32], sizes = [8, 32], strides = [1, 1]} : vector<8x96xf32> to vector<8x32xf32>
    %412 = vector.extract_strided_slice %407 {offsets = [0, 64], sizes = [8, 32], strides = [1, 1]} : vector<8x96xf32> to vector<8x32xf32>
    %413 = arith.mulf %411, %393 : vector<8x32xf32>
    %414 = arith.mulf %410, %409 : vector<8x32xf32>
    %415 = arith.addf %413, %414 : vector<8x32xf32>
    %416 = math.tanh %415 : vector<8x32xf32>
    %417 = arith.mulf %412, %416 : vector<8x32xf32>
    %c6_i32_118 = arith.constant 6 : i32
    %418 = arith.index_cast %c6_i32_118 : i32 to index
    %c0_119 = arith.constant 0 : index
    %c0_120 = arith.constant 0 : index
    %419 = vector.load %arg11[%418, %c0_119, %c0_120] : memref<10x8x128xf32, #tpu.memory_space<vmem>>, vector<1x8x128xf32>
    %420 = vector.shape_cast %419 : vector<1x8x128xf32> to vector<8x128xf32>
    %421 = arith.truncf %417 : vector<8x32xf32> to vector<8x32xbf16>
    %cst_121 = arith.constant dense<0.000000e+00> : vector<8x128xf32>
    %422 = tpu.matmul %421, %274, %cst_121 {dimension_numbers = #tpu.dot_dimension_numbers<[1], [0], [0], [1], [0, 0, 1, 1], [], []>} : vector<8x32xbf16>, vector<32x128xbf16>, vector<8x128xf32> -> vector<8x128xf32>
    %423 = arith.addf %420, %422 : vector<8x128xf32>
    %424 = vector.extract_strided_slice %423 {offsets = [0, 0], sizes = [8, 96], strides = [1, 1]} : vector<8x128xf32> to vector<8x96xf32>
    %425 = arith.negf %424 : vector<8x96xf32>
    %426 = math.exp %425 : vector<8x96xf32>
    %cst_122 = arith.constant 1.000000e+00 : f32
    %427 = vector.broadcast %cst_122 : f32 to vector<8x96xf32>
    %428 = arith.addf %427, %426 : vector<8x96xf32>
    %429 = arith.divf %427, %428 : vector<8x96xf32>
    %430 = vector.extract_strided_slice %423 {offsets = [0, 96], sizes = [8, 32], strides = [1, 1]} : vector<8x128xf32> to vector<8x32xf32>
    %431 = math.tanh %430 : vector<8x32xf32>
    %432 = vector.extract_strided_slice %429 {offsets = [0, 0], sizes = [8, 32], strides = [1, 1]} : vector<8x96xf32> to vector<8x32xf32>
    %433 = vector.extract_strided_slice %429 {offsets = [0, 32], sizes = [8, 32], strides = [1, 1]} : vector<8x96xf32> to vector<8x32xf32>
    %434 = vector.extract_strided_slice %429 {offsets = [0, 64], sizes = [8, 32], strides = [1, 1]} : vector<8x96xf32> to vector<8x32xf32>
    %435 = arith.mulf %433, %415 : vector<8x32xf32>
    %436 = arith.mulf %432, %431 : vector<8x32xf32>
    %437 = arith.addf %435, %436 : vector<8x32xf32>
    %438 = math.tanh %437 : vector<8x32xf32>
    %439 = arith.mulf %434, %438 : vector<8x32xf32>
    %c7_i32_123 = arith.constant 7 : i32
    %440 = arith.index_cast %c7_i32_123 : i32 to index
    %c0_124 = arith.constant 0 : index
    %c0_125 = arith.constant 0 : index
    %441 = vector.load %arg11[%440, %c0_124, %c0_125] : memref<10x8x128xf32, #tpu.memory_space<vmem>>, vector<1x8x128xf32>
    %442 = vector.shape_cast %441 : vector<1x8x128xf32> to vector<8x128xf32>
    %443 = arith.truncf %439 : vector<8x32xf32> to vector<8x32xbf16>
    %cst_126 = arith.constant dense<0.000000e+00> : vector<8x128xf32>
    %444 = tpu.matmul %443, %274, %cst_126 {dimension_numbers = #tpu.dot_dimension_numbers<[1], [0], [0], [1], [0, 0, 1, 1], [], []>} : vector<8x32xbf16>, vector<32x128xbf16>, vector<8x128xf32> -> vector<8x128xf32>
    %445 = arith.addf %442, %444 : vector<8x128xf32>
    %446 = vector.extract_strided_slice %445 {offsets = [0, 0], sizes = [8, 96], strides = [1, 1]} : vector<8x128xf32> to vector<8x96xf32>
    %447 = arith.negf %446 : vector<8x96xf32>
    %448 = math.exp %447 : vector<8x96xf32>
    %cst_127 = arith.constant 1.000000e+00 : f32
    %449 = vector.broadcast %cst_127 : f32 to vector<8x96xf32>
    %450 = arith.addf %449, %448 : vector<8x96xf32>
    %451 = arith.divf %449, %450 : vector<8x96xf32>
    %452 = vector.extract_strided_slice %445 {offsets = [0, 96], sizes = [8, 32], strides = [1, 1]} : vector<8x128xf32> to vector<8x32xf32>
    %453 = math.tanh %452 : vector<8x32xf32>
    %454 = vector.extract_strided_slice %451 {offsets = [0, 0], sizes = [8, 32], strides = [1, 1]} : vector<8x96xf32> to vector<8x32xf32>
    %455 = vector.extract_strided_slice %451 {offsets = [0, 32], sizes = [8, 32], strides = [1, 1]} : vector<8x96xf32> to vector<8x32xf32>
    %456 = vector.extract_strided_slice %451 {offsets = [0, 64], sizes = [8, 32], strides = [1, 1]} : vector<8x96xf32> to vector<8x32xf32>
    %457 = arith.mulf %455, %437 : vector<8x32xf32>
    %458 = arith.mulf %454, %453 : vector<8x32xf32>
    %459 = arith.addf %457, %458 : vector<8x32xf32>
    %460 = math.tanh %459 : vector<8x32xf32>
    %461 = arith.mulf %456, %460 : vector<8x32xf32>
    %c8_i32_128 = arith.constant 8 : i32
    %462 = arith.index_cast %c8_i32_128 : i32 to index
    %c0_129 = arith.constant 0 : index
    %c0_130 = arith.constant 0 : index
    %463 = vector.load %arg11[%462, %c0_129, %c0_130] : memref<10x8x128xf32, #tpu.memory_space<vmem>>, vector<1x8x128xf32>
    %464 = vector.shape_cast %463 : vector<1x8x128xf32> to vector<8x128xf32>
    %465 = arith.truncf %461 : vector<8x32xf32> to vector<8x32xbf16>
    %cst_131 = arith.constant dense<0.000000e+00> : vector<8x128xf32>
    %466 = tpu.matmul %465, %274, %cst_131 {dimension_numbers = #tpu.dot_dimension_numbers<[1], [0], [0], [1], [0, 0, 1, 1], [], []>} : vector<8x32xbf16>, vector<32x128xbf16>, vector<8x128xf32> -> vector<8x128xf32>
    %467 = arith.addf %464, %466 : vector<8x128xf32>
    %468 = vector.extract_strided_slice %467 {offsets = [0, 0], sizes = [8, 96], strides = [1, 1]} : vector<8x128xf32> to vector<8x96xf32>
    %469 = arith.negf %468 : vector<8x96xf32>
    %470 = math.exp %469 : vector<8x96xf32>
    %cst_132 = arith.constant 1.000000e+00 : f32
    %471 = vector.broadcast %cst_132 : f32 to vector<8x96xf32>
    %472 = arith.addf %471, %470 : vector<8x96xf32>
    %473 = arith.divf %471, %472 : vector<8x96xf32>
    %474 = vector.extract_strided_slice %467 {offsets = [0, 96], sizes = [8, 32], strides = [1, 1]} : vector<8x128xf32> to vector<8x32xf32>
    %475 = math.tanh %474 : vector<8x32xf32>
    %476 = vector.extract_strided_slice %473 {offsets = [0, 0], sizes = [8, 32], strides = [1, 1]} : vector<8x96xf32> to vector<8x32xf32>
    %477 = vector.extract_strided_slice %473 {offsets = [0, 32], sizes = [8, 32], strides = [1, 1]} : vector<8x96xf32> to vector<8x32xf32>
    %478 = vector.extract_strided_slice %473 {offsets = [0, 64], sizes = [8, 32], strides = [1, 1]} : vector<8x96xf32> to vector<8x32xf32>
    %479 = arith.mulf %477, %459 : vector<8x32xf32>
    %480 = arith.mulf %476, %475 : vector<8x32xf32>
    %481 = arith.addf %479, %480 : vector<8x32xf32>
    %482 = math.tanh %481 : vector<8x32xf32>
    %483 = arith.mulf %478, %482 : vector<8x32xf32>
    %c9_i32_133 = arith.constant 9 : i32
    %484 = arith.index_cast %c9_i32_133 : i32 to index
    %c0_134 = arith.constant 0 : index
    %c0_135 = arith.constant 0 : index
    %485 = vector.load %arg11[%484, %c0_134, %c0_135] : memref<10x8x128xf32, #tpu.memory_space<vmem>>, vector<1x8x128xf32>
    %486 = vector.shape_cast %485 : vector<1x8x128xf32> to vector<8x128xf32>
    %487 = arith.truncf %483 : vector<8x32xf32> to vector<8x32xbf16>
    %cst_136 = arith.constant dense<0.000000e+00> : vector<8x128xf32>
    %488 = tpu.matmul %487, %274, %cst_136 {dimension_numbers = #tpu.dot_dimension_numbers<[1], [0], [0], [1], [0, 0, 1, 1], [], []>} : vector<8x32xbf16>, vector<32x128xbf16>, vector<8x128xf32> -> vector<8x128xf32>
    %489 = arith.addf %486, %488 : vector<8x128xf32>
    %490 = vector.extract_strided_slice %489 {offsets = [0, 0], sizes = [8, 96], strides = [1, 1]} : vector<8x128xf32> to vector<8x96xf32>
    %491 = arith.negf %490 : vector<8x96xf32>
    %492 = math.exp %491 : vector<8x96xf32>
    %cst_137 = arith.constant 1.000000e+00 : f32
    %493 = vector.broadcast %cst_137 : f32 to vector<8x96xf32>
    %494 = arith.addf %493, %492 : vector<8x96xf32>
    %495 = arith.divf %493, %494 : vector<8x96xf32>
    %496 = vector.extract_strided_slice %489 {offsets = [0, 96], sizes = [8, 32], strides = [1, 1]} : vector<8x128xf32> to vector<8x32xf32>
    %497 = math.tanh %496 : vector<8x32xf32>
    %498 = vector.extract_strided_slice %495 {offsets = [0, 0], sizes = [8, 32], strides = [1, 1]} : vector<8x96xf32> to vector<8x32xf32>
    %499 = vector.extract_strided_slice %495 {offsets = [0, 32], sizes = [8, 32], strides = [1, 1]} : vector<8x96xf32> to vector<8x32xf32>
    %500 = vector.extract_strided_slice %495 {offsets = [0, 64], sizes = [8, 32], strides = [1, 1]} : vector<8x96xf32> to vector<8x32xf32>
    %501 = arith.mulf %499, %481 : vector<8x32xf32>
    %502 = arith.mulf %498, %497 : vector<8x32xf32>
    %503 = arith.addf %501, %502 : vector<8x32xf32>
    %504 = math.tanh %503 : vector<8x32xf32>
    %505 = arith.mulf %500, %504 : vector<8x32xf32>
    %c10_i32_138 = arith.constant 10 : i32
    %506 = arith.truncf %505 : vector<8x32xf32> to vector<8x32xbf16>
    %c0_139 = arith.constant 0 : index
    %c0_140 = arith.constant 0 : index
    %507 = vector.load %arg8[%c0_139, %c0_140] : memref<32x128xbf16, #tpu.memory_space<vmem>>, vector<32x128xbf16>
    %cst_141 = arith.constant dense<0.000000e+00> : vector<8x128xf32>
    %508 = tpu.matmul %506, %507, %cst_141 {dimension_numbers = #tpu.dot_dimension_numbers<[1], [0], [0], [1], [0, 0, 1, 1], [], []>} : vector<8x32xbf16>, vector<32x128xbf16>, vector<8x128xf32> -> vector<8x128xf32>
    %c0_142 = arith.constant 0 : index
    %c0_143 = arith.constant 0 : index
    %509 = vector.load %arg9[%c0_142, %c0_143] : memref<1x128xf32, #tpu.memory_space<vmem>>, vector<1x128xf32>
    %510 = vector.broadcast %509 : vector<1x128xf32> to vector<8x128xf32>
    %511 = arith.addf %508, %510 : vector<8x128xf32>
    %c0_144 = arith.constant 0 : index
    %c0_145 = arith.constant 0 : index
    %512 = vector.load %arg10[%c0_144, %c0_145] : memref<8x128xf32, #tpu.memory_space<vmem>>, vector<8x128xf32>
    tpu.vector_store %arg10[%c0_144, %c0_145], %511 {strides = array<i32>} : memref<8x128xf32, #tpu.memory_space<vmem>>, vector<8x128xf32>,
    return
  }
  func.func @transform_0(%arg0: i32) -> (i32, i32, i32) {
    %c0_i32 = arith.constant 0 : i32
    %c0_i32_0 = arith.constant 0 : i32
    %c0_i32_1 = arith.constant 0 : i32
    return %c0_i32, %arg0, %c0_i32_0 : i32, i32, i32
  }
  func.func @transform_1(%arg0: i32) -> (i32, i32) {
    %c0_i32 = arith.constant 0 : i32
    %c0_i32_0 = arith.constant 0 : i32
    %c0_i32_1 = arith.constant 0 : i32
    return %c0_i32, %c0_i32_0 : i32, i32
  }
  func.func @transform_2(%arg0: i32) -> (i32, i32) {
    %c0_i32 = arith.constant 0 : i32
    %c0_i32_0 = arith.constant 0 : i32
    %c0_i32_1 = arith.constant 0 : i32
    return %c0_i32, %c0_i32_0 : i32, i32
  }
  func.func @transform_3(%arg0: i32) -> (i32, i32) {
    %c0_i32 = arith.constant 0 : i32
    %c0_i32_0 = arith.constant 0 : i32
    %c0_i32_1 = arith.constant 0 : i32
    return %c0_i32, %c0_i32_0 : i32, i32
  }
  func.func @transform_4(%arg0: i32) -> (i32, i32) {
    %c0_i32 = arith.constant 0 : i32
    %c0_i32_0 = arith.constant 0 : i32
    %c0_i32_1 = arith.constant 0 : i32
    return %c0_i32, %c0_i32_0 : i32, i32
  }
  func.func @transform_5(%arg0: i32) -> (i32, i32) {
    %c0_i32 = arith.constant 0 : i32
    %c0_i32_0 = arith.constant 0 : i32
    %c0_i32_1 = arith.constant 0 : i32
    return %c0_i32, %c0_i32_0 : i32, i32
  }
  func.func @transform_6(%arg0: i32) -> (i32, i32) {
    %c0_i32 = arith.constant 0 : i32
    %c0_i32_0 = arith.constant 0 : i32
    %c0_i32_1 = arith.constant 0 : i32
    return %c0_i32, %c0_i32_0 : i32, i32
  }
  func.func @transform_7(%arg0: i32) -> (i32, i32) {
    %c0_i32 = arith.constant 0 : i32
    %c0_i32_0 = arith.constant 0 : i32
    %c0_i32_1 = arith.constant 0 : i32
    return %c0_i32, %c0_i32_0 : i32, i32
  }
  func.func @transform_8(%arg0: i32) -> (i32, i32) {
    %c0_i32 = arith.constant 0 : i32
    %c0_i32_0 = arith.constant 0 : i32
    %c0_i32_1 = arith.constant 0 : i32
    return %c0_i32, %c0_i32_0 : i32, i32
  }
  func.func @transform_9(%arg0: i32) -> (i32, i32) {
    %c0_i32 = arith.constant 0 : i32
    %c0_i32_0 = arith.constant 0 : i32
    return %arg0, %c0_i32 : i32, i32
  }
}

</mosaic_0001>

<bundles_post_ra>
// kernel: lstm_based_model.1
= control target key start
LH: loop header
LB: loop body
LE: loop exit
PB: predicated region body
PF: predicated region fallthrough
CT: control target
= control target key end

     0   :  { %v2610_v1 = vmov 0.0   ;;  %vm2611_vm0 = vmmov 0   ;;  %v2612_v21 = vmov 0   ;;  %s2613_s11 = smov 32   ;;  %vm298_vm1 = vcmask 261120   ;;  %s3174_s1 = inlined_call_operand.vmem [shape: bf16[256,128], index: 1, kind: input, shape index: {}]   ;;  %s3175_s2 = inlined_call_operand.vmem [shape: bf16[32,128], index: 2, kind: input, shape index: {}]   ;;  %s3176_s0 = inlined_call_operand.vmem [shape: f32[10,8,256], index: 0, kind: input, shape index: {}]   ;;  %s3177_s3 = inlined_call_operand.vmem [shape: f32[1,128], index: 3, kind: input, shape index: {}]   ;;  %s3178_s4 = inlined_call_operand.vmem [shape: bf16[32,128], index: 4, kind: input, shape index: {}]   ;;  %s3179_s5 = inlined_call_operand.vmem [shape: bf16[32,128], index: 5, kind: input, shape index: {}]   ;;  %s3180_s6 = inlined_call_operand.vmem [shape: f32[1,128], index: 6, kind: input, shape index: {}]   ;;  %s3181_s7 = inlined_call_operand.vmem [shape: bf16[32,128], index: 7, kind: input, shape index: {}]   ;;  %s3182_s8 = inlined_call_operand.vmem [shape: f32[1,128], index: 8, kind: input, shape index: {}]   ;;  %s3183_s9 = inlined_call_operand.vmem [shape: f32[8,128], index: 9, kind: output, shape index: {}]  }
   0x1   :  { %v2426_v0 = vld [vmem:[%s3174_s1 + $0x40] sm:$0xff]   ;;  %2229 = vmatprep.subr.bf16.mxu1 %v2610_v1  ;;  %2233 = vmatprep.mubr.msk.bf16.mxu1 %vm2611_vm0, %v2610_v1  ;;  %v2428_v3 = vld [vmem:[%s3174_s1 + $0x48] sm:$0xff]   ;;  %v2430_v5 = vld [vmem:[%s3174_s1 + $0x50] sm:$0xff]  }
   0x2   :  { %v2427_v2 = vld [vmem:[%s3174_s1] sm:$0xff]   ;;  %2113 = vmatprep.subr.bf16.mxu0 %v2426_v0  ;;  %v2429_v4 = vld [vmem:[%s3174_s1 + $0x8] sm:$0xff]   ;;  %v2431_v6 = vld [vmem:[%s3174_s1 + $0x10] sm:$0xff]  }
   0x3   :  { %2114 = vmatpush3.bf16.msra.mxu0 %v2427_v2  ;;  %v2432_v7 = vld [vmem:[%s3174_s1 + $0x58] sm:$0xff]   ;;  %v2434_v9 = vld [vmem:[%s3174_s1 + $0x60] sm:$0xff]   ;;  %v2436_v12 = vld [vmem:[%s3174_s1 + $0x68] sm:$0xff]  }
   0x4   :  { %2115 = vmatprep.subr.bf16.mxu0 %v2428_v3  ;;  %v2433_v8 = vld [vmem:[%s3174_s1 + $0x18] sm:$0xff]   ;;  %v2698_v10 = vld [vmem:[%s3175_s2] sm:$0xff]   ;;  %v71_v13 = vld [vmem:[%s3176_s0 + $0x8] sm:$0xff] }
   0x5   :  { %v2435_v11 = vld [vmem:[%s3174_s1 + $0x20] sm:$0xff]   ;;  %2230 = vmatpush3.bf16.msra.mxu1 %v2698_v10  ;;  %v73_v14 = vld [vmem:[%s3176_s0 + $0x18] sm:$0xff]  ;;  %v2717_v16 = vld [vmem:[%s3175_s2 + $0x8] sm:$0xff]  }
   0x6   :  { %2231 = vmatprep.subr.bf16.mxu1 %v2610_v1  ;;  %v91_v15 = vpack.c.bf16 %v73_v14, %v71_v13  ;;  %v2437_v17 = vld [vmem:[%s3174_s1 + $0x28] sm:$0xff]   ;;  %v2438_v18 = vld [vmem:[%s3174_s1 + $0x70] sm:$0xff]   ;;  %v2441_v20 = vld [vmem:[%s3174_s1 + $0x78] sm:$0xff]  }
   0x7   :  { %2116 = vmatpush3.bf16.msra.mxu0 %v2429_v4  ;;  %v2439_v19 = vld [vmem:[%s3174_s1 + $0x30] sm:$0xff]   ;;  %v2442_v22 = vld [vmem:[%s3174_s1 + $0x38] sm:$0xff]   ;;  %v70_v23 = vld [vmem:[%s3176_s0] sm:$0xff] }
   0x8   :  { %2117 = vmatprep.subr.bf16.mxu0 %v2430_v5  ;;  %234 = vmatprep.mubr.bf16.mxu0 %v91_v15  ;;  %v72_v24 = vld [vmem:[%s3176_s0 + $0x10] sm:$0xff]  ;;  %v2757_v32 = vld [vmem:[%s3177_s3] ss:$0 sm:$0xff]  ;;  %s2614_s3 = smov 64  }
   0x9   :  { %2232 = vmatpush3.bf16.msra.mxu1 %v2717_v16  ;;  %v90_v25 = vpack.c.bf16 %v72_v24, %v70_v23 }
   0xa   :  { %2237 = vmatprep.subr.bf16.mxu1 %v2610_v1 }
   0xb   :  { %2118 = vmatpush3.bf16.msra.mxu0 %v2431_v6 }
   0xc   :  { %2119 = vmatprep.subr.bf16.mxu0 %v2432_v7  ;;  %2234 = vmatmul.mubr.bf16.vlgmr.msra.gmra.mrb[0].mxu1 %v2612_v21  ;;  %v75_v7 = vld [vmem:[%s3176_s0 + $0x28] sm:$0xff] }
   0xd   :  { %2238 = vmatpush3.bf16.msra.mxu1 %v2698_v10  ;;  %2241 = vmatprep.mubr.msk.bf16.mxu1 %vm2611_vm0, %v2610_v1 }
   0xe   :  { %2239 = vmatprep.subr.bf16.mxu1 %v2610_v1 }
   0xf   :  { %2120 = vmatpush3.bf16.msra.mxu0 %v2433_v8  ;;  %v77_v8 = vld [vmem:[%s3176_s0 + $0x38] sm:$0xff] }
  0x10   :  { %2121 = vmatprep.subr.bf16.mxu0 %v2434_v9  ;;  %v74_v9 = vld [vmem:[%s3176_s0 + $0x20] sm:$0xff] }
  0x11   :  { %2240 = vmatpush3.bf16.msra.mxu1 %v2717_v16 }
  0x12   :  { %2245 = vmatprep.subr.bf16.mxu1 %v2610_v1 }
  0x13   :  { %2122 = vmatpush3.bf16.msra.mxu0 %v2435_v11  ;;  %v93_v11 = vpack.c.bf16 %v77_v8, %v75_v7  ;;  %v80_v7 = vld [vmem:[%s3176_s0 + $0x50] sm:$0xff] }
  0x14   :  { %2123 = vmatprep.subr.bf16.mxu0 %v2436_v12  ;;  %v76_v12 = vld [vmem:[%s3176_s0 + $0x30] sm:$0xff] }
  0x15   :  { %v92_v13 = vpack.c.bf16 %v76_v12, %v74_v9 }
  0x17   :  { %2124 = vmatpush3.bf16.msra.mxu0 %v2437_v17 }
  0x18   :  { %2125 = vmatprep.subr.bf16.mxu0 %v2438_v18 }
  0x1b   :  { %2126 = vmatpush3.bf16.msra.mxu0 %v2439_v19 }
  0x1c   :  { %2127 = vmatprep.subr.bf16.mxu0 %v2441_v20 }
  0x1f   :  { %2128 = vmatpush3.bf16.msra.mxu0 %v2442_v22 }
  0x20   :  { %2293 = vmatprep.subr.bf16.mxu0 %v2610_v1 }
  0x22   :  { %235 = vmatmul.mubr.bf16.vlgmr.msra.gmra.mrb[0].mxu0 %v90_v25 }
  0x23   :  { %2294 = vmatpush3.bf16.msra.mxu0 %v2698_v10  ;;  %242 = vmatprep.mubr.bf16.mxu0 %v93_v11 }
  0x24   :  { %2295 = vmatprep.subr.bf16.mxu0 %v2610_v1 }
  0x27   :  { %2296 = vmatpush3.bf16.msra.mxu0 %v2717_v16 }
  0x28   :  { %2309 = vmatprep.subr.bf16.mxu0 %v2610_v1 }
  0x2a   :  { %243 = vmatmul.mubr.bf16.gmra.mrb[4].mxu0 %v92_v13 }
  0xdf   :  { %v336_v26 = vpop.f32.mrb[0].mxu1 }
  0xe0   :  { %v2235_v27 = vpop.f32.mrb[1].mxu1 }
  0xe1   :  { %v339_v28 = vpop.f32.mrb[2].mxu1 }
  0xe2   :  { %v2236_v29 = vpop.f32.mrb[3].mxu1 }
  0xf5   :  { %v2129_v30 = vpop.f32.mrb[0].mxu0 }
  0xf6   :  { %v2130_v31 = vpop.f32.mrb[1].mxu0 }
  0xf7   :  { %v2131_v33 = vadd.f32 %v2130_v31, %v2129_v30  ;;  %v2132_v34 = vpop.f32.mrb[2].mxu0 }
  0xf8   :  { %v2133_v35 = vpop.f32.mrb[3].mxu0 }
  0xf9   :  { %v237_v36 = vadd.f32 %v2131_v33, %v2757_v32  ;;  %v2134_v37 = vadd.f32 %v2133_v35, %v2132_v34 }
  0xfb   :  { %v342_v38 = vadd.f32 %v336_v26, %v237_v36  ;;  %v240_v54 = vadd.f32 %v2134_v37, %v2757_v32 }
  0xfd   :  { %2450 = vtanh.f32 %v342_v38  ;;  %v2061_v40 = vmul.f32 -1.442695, %v342_v38  ;;  %v2135_v19 = vpop.f32.mrb[4].mxu0 }
  0xfe   :  { %v2136_v20 = vpop.f32.mrb[5].mxu0 }
  0xff   :  { %2452 = vpow2.f32 %v2061_v40  ;;  %v2137_v22 = vadd.f32 %v2136_v20, %v2135_v19  ;;  %v2138_v23 = vpop.f32.mrb[6].mxu0 }
 0x100   :  { %v2139_v24 = vpop.f32.mrb[7].mxu0 }
 0x101   :  { %v2140_v25 = vadd.f32 %v2139_v24, %v2138_v23  ;;  %v245_v27 = vadd.f32 %v2137_v22, %v2757_v32 }
 0x107   :  { %v2451_v39 = vpop.eup %2450 }
 0x108   :  { %352 = vrot.lane.b32.xlu0 %v2451_v39, %s2613_s11 }
 0x109   :  { %v2453_v41 = vpop.eup %2452 }
 0x10a   :  { %v346_v42 = vadd.f32 1.0, %v2453_v41 }
 0x10c   :  { %2454 = vrcp.f32 %v346_v42 }
 0x116   :  { %v2455_v43 = vpop.eup %2454 }
 0x117   :  { %v350_v46 = vmul.f32 0.0, %v2455_v43 }
 0x17a   :  { %v353_v44 = vpop.permute.xlu0 %352 }
 0x17b   :  { %v355_v45 = vmul.f32 %v2455_v43, %v353_v44 }
 0x17d   :  { %357 = vrot.lane.b32.xlu0 %v355_v45, %s2613_s11 }
 0x1ef   :  { %v358_v47 = vpop.permute.xlu0 %357 }
 0x1f0   :  { %v360_v48 = vadd.f32 %v358_v47, %v350_v46 }
 0x1f2   :  { %2456 = vtanh.f32 %v360_v48 }
 0x1fc   :  { %v2457_v49 = vpop.eup %2456 }
 0x1fd   :  { %363 = vrot.lane.b32.xlu1 %v2457_v49, %s2613_s11  ;;  %v248_v49 = vadd.f32 %v2140_v25, %v2757_v32 }
 0x26f   :  { %v364_v50 = vpop.permute.xlu1 %363 }
 0x270   :  { %v2763_v51 = vmul.f32 %v2455_v43, %v364_v50 }
 0x272   :  { %v374_v52 = vpack.c.bf16 %v2763_v51, %v2763_v51 }
 0x274   :  { %376 = vrot.lane.b32.xlu1 %v374_v52, %s2614_s3 }
 0x2e6   :  { %v377_v53 = vpop.permute.xlu1 %376 }
 0x2e7   :  { %2242 = vmatmul.mubr.msk.bf16.vlgmr.msra.gmra.mrb[4].mxu1 %vm298_vm1, %v377_v53 }
 0x2e8   :  { %2246 = vmatpush3.bf16.msra.mxu1 %v2698_v10  ;;  %2249 = vmatprep.mubr.msk.bf16.mxu1 %vm2611_vm0, %v2610_v1 }
 0x2e9   :  { %2247 = vmatprep.subr.bf16.mxu1 %v2610_v1 }
 0x2ec   :  { %2248 = vmatpush3.bf16.msra.mxu1 %v2717_v16 }
 0x2ed   :  { %2253 = vmatprep.subr.bf16.mxu1 %v2610_v1 }
 0x3ba   :  { %v415_v55 = vpop.f32.mrb[4].mxu1 }
 0x3bb   :  { %v421_v56 = vadd.f32 %v415_v55, %v240_v54  ;;  %v2243_v57 = vpop.f32.mrb[5].mxu1 }
 0x3bc   :  { %v418_v58 = vpop.f32.mrb[6].mxu1 }
 0x3bd   :  { %2458 = vtanh.f32 %v421_v56  ;;  %v2244_v59 = vpop.f32.mrb[7].mxu1  ;;  %v2063_v61 = vmul.f32 -1.442695, %v421_v56 }
 0x3bf   :  { %2460 = vpow2.f32 %v2063_v61 }
 0x3c7   :  { %v2459_v60 = vpop.eup %2458 }
 0x3c8   :  { %431 = vrot.lane.b32.xlu0 %v2459_v60, %s2613_s11 }
 0x3c9   :  { %v2461_v62 = vpop.eup %2460 }
 0x3ca   :  { %v425_v63 = vadd.f32 1.0, %v2461_v62 }
 0x3cc   :  { %2462 = vrcp.f32 %v425_v63 }
 0x3d6   :  { %v2463_v0 = vpop.eup %2462 }
 0x3d7   :  { %v429_v4 = vmul.f32 %v2463_v0, %v360_v48 }
 0x43a   :  { %v432_v2 = vpop.permute.xlu0 %431 }
 0x43b   :  { %v434_v3 = vmul.f32 %v2463_v0, %v432_v2 }
 0x43d   :  { %436 = vrot.lane.b32.xlu1 %v434_v3, %s2613_s11  ;;  %v79_v3 = vld [vmem:[%s3176_s0 + $0x48] sm:$0xff] }
 0x4af   :  { %v437_v5 = vpop.permute.xlu1 %436 }
 0x4b0   :  { %v439_v6 = vadd.f32 %v437_v5, %v429_v4  ;;  %v81_v4 = vld [vmem:[%s3176_s0 + $0x58] sm:$0xff]  ;;  %v78_v5 = vld [vmem:[%s3176_s0 + $0x40] sm:$0xff] }
 0x4b1   :  { %v94_v8 = vpack.c.bf16 %v80_v7, %v78_v5  ;;  %v84_v5 = vld [vmem:[%s3176_s0 + $0x70] sm:$0xff] }
 0x4b2   :  { %2464 = vtanh.f32 %v439_v6 }
 0x4bc   :  { %v2465_v14 = vpop.eup %2464 }
 0x4bd   :  { %442 = vrot.lane.b32.xlu0 %v2465_v14, %s2613_s11 }
 0x52f   :  { %v443_v15 = vpop.permute.xlu0 %442 }
 0x530   :  { %v2791_v17 = vmul.f32 %v2463_v0, %v443_v15 }
 0x532   :  { %v454_v18 = vpack.c.bf16 %v2791_v17, %v2791_v17 }
 0x534   :  { %456 = vrot.lane.b32.xlu1 %v454_v18, %s2614_s3 }
 0x5a6   :  { %v457_v26 = vpop.permute.xlu1 %456 }
 0x5a7   :  { %2250 = vmatmul.mubr.msk.bf16.vlgmr.msra.gmra.mrb[8].mxu1 %vm298_vm1, %v457_v26 }
 0x5a8   :  { %2254 = vmatpush3.bf16.msra.mxu1 %v2698_v10  ;;  %2257 = vmatprep.mubr.msk.bf16.mxu1 %vm2611_vm0, %v2610_v1 }
 0x5a9   :  { %2255 = vmatprep.subr.bf16.mxu1 %v2610_v1 }
 0x5ac   :  { %2256 = vmatpush3.bf16.msra.mxu1 %v2717_v16 }
 0x5ad   :  { %2261 = vmatprep.subr.bf16.mxu1 %v2610_v1 }
 0x67a   :  { %v495_v28 = vpop.f32.mrb[8].mxu1 }
 0x67b   :  { %v501_v29 = vadd.f32 %v495_v28, %v245_v27  ;;  %v2251_v30 = vpop.f32.mrb[9].mxu1 }
 0x67c   :  { %v498_v31 = vpop.f32.mrb[10].mxu1 }
 0x67d   :  { %2466 = vtanh.f32 %v501_v29  ;;  %v2252_v33 = vpop.f32.mrb[11].mxu1  ;;  %v2065_v35 = vmul.f32 -1.442695, %v501_v29 }
 0x67f   :  { %2468 = vpow2.f32 %v2065_v35 }
 0x687   :  { %v2467_v34 = vpop.eup %2466 }
 0x688   :  { %511 = vrot.lane.b32.xlu0 %v2467_v34, %s2613_s11 }
 0x689   :  { %v2469_v36 = vpop.eup %2468 }
 0x68a   :  { %v505_v37 = vadd.f32 1.0, %v2469_v36 }
 0x68c   :  { %2470 = vrcp.f32 %v505_v37 }
 0x696   :  { %v2471_v38 = vpop.eup %2470 }
 0x697   :  { %v509_v41 = vmul.f32 %v2471_v38, %v439_v6  ;;  %v95_v6 = vpack.c.bf16 %v81_v4, %v79_v3  ;;  %v82_v3 = vld [vmem:[%s3176_s0 + $0x60] sm:$0xff] }
 0x699   :  { %250 = vmatprep.mubr.bf16.mxu0 %v95_v6  ;;  %v96_v6 = vpack.c.bf16 %v84_v5, %v82_v3  ;;  %v88_v3 = vld [vmem:[%s3176_s0 + $0x90] sm:$0xff] }
 0x69a   :  { %251 = vmatmul.mubr.bf16.gmra.mrb[8].mxu0 %v94_v8 }
 0x6fa   :  { %v512_v39 = vpop.permute.xlu0 %511 }
 0x6fb   :  { %v514_v40 = vmul.f32 %v2471_v38, %v512_v39 }
 0x6fd   :  { %516 = vrot.lane.b32.xlu1 %v514_v40, %s2613_s11 }
 0x76d   :  { %v2141_v14 = vpop.f32.mrb[8].mxu0 }
 0x76e   :  { %v2142_v15 = vpop.f32.mrb[9].mxu0 }
 0x76f   :  { %v517_v42 = vpop.permute.xlu1 %516  ;;  %v2143_v18 = vadd.f32 %v2142_v15, %v2141_v14  ;;  %v2144_v19 = vpop.f32.mrb[10].mxu0 }
 0x770   :  { %v519_v43 = vadd.f32 %v517_v42, %v509_v41  ;;  %v2145_v20 = vpop.f32.mrb[11].mxu0 }
 0x771   :  { %v2146_v22 = vadd.f32 %v2145_v20, %v2144_v19  ;;  %v253_v24 = vadd.f32 %v2143_v18, %v2757_v32 }
 0x772   :  { %2472 = vtanh.f32 %v519_v43 }
 0x77c   :  { %v2473_v44 = vpop.eup %2472 }
 0x77d   :  { %522 = vrot.lane.b32.xlu0 %v2473_v44, %s2613_s11 }
 0x7ef   :  { %v523_v45 = vpop.permute.xlu0 %522 }
 0x7f0   :  { %v2807_v46 = vmul.f32 %v2471_v38, %v523_v45 }
 0x7f2   :  { %v534_v47 = vpack.c.bf16 %v2807_v46, %v2807_v46 }
 0x7f4   :  { %536 = vrot.lane.b32.xlu1 %v534_v47, %s2614_s3  ;;  %v256_v47 = vadd.f32 %v2146_v22, %v2757_v32 }
 0x866   :  { %v537_v48 = vpop.permute.xlu1 %536 }
 0x867   :  { %2258 = vmatmul.mubr.msk.bf16.vlgmr.msra.gmra.mrb[12].mxu1 %vm298_vm1, %v537_v48 }
 0x868   :  { %2262 = vmatpush3.bf16.msra.mxu1 %v2698_v10  ;;  %2265 = vmatprep.mubr.msk.bf16.mxu1 %vm2611_vm0, %v2610_v1 }
 0x869   :  { %2263 = vmatprep.subr.bf16.mxu1 %v2610_v1 }
 0x86c   :  { %2264 = vmatpush3.bf16.msra.mxu1 %v2717_v16 }
 0x86d   :  { %2269 = vmatprep.subr.bf16.mxu1 %v2610_v1 }
 0x93a   :  { %v575_v50 = vpop.f32.mrb[12].mxu1 }
 0x93b   :  { %v581_v52 = vadd.f32 %v575_v50, %v248_v49  ;;  %v2259_v53 = vpop.f32.mrb[13].mxu1 }
 0x93c   :  { %v578_v54 = vpop.f32.mrb[14].mxu1 }
 0x93d   :  { %2474 = vtanh.f32 %v581_v52  ;;  %v2260_v55 = vpop.f32.mrb[15].mxu1  ;;  %v2067_v57 = vmul.f32 -1.442695, %v581_v52 }
 0x93f   :  { %2476 = vpow2.f32 %v2067_v57 }
 0x947   :  { %v2475_v56 = vpop.eup %2474 }
 0x948   :  { %591 = vrot.lane.b32.xlu0 %v2475_v56, %s2613_s11 }
 0x949   :  { %v2477_v58 = vpop.eup %2476 }
 0x94a   :  { %v585_v59 = vadd.f32 1.0, %v2477_v58 }
 0x94c   :  { %2478 = vrcp.f32 %v585_v59 }
 0x956   :  { %v2479_v60 = vpop.eup %2478 }
 0x957   :  { %v589_v63 = vmul.f32 %v2479_v60, %v519_v43 }
 0x9ba   :  { %v592_v61 = vpop.permute.xlu0 %591 }
 0x9bb   :  { %v594_v62 = vmul.f32 %v2479_v60, %v592_v61 }
 0x9bd   :  { %596 = vrot.lane.b32.xlu1 %v594_v62, %s2613_s11 }
 0xa2f   :  { %v597_v0 = vpop.permute.xlu1 %596 }
 0xa30   :  { %v599_v2 = vadd.f32 %v597_v0, %v589_v63  ;;  %v83_v0 = vld [vmem:[%s3176_s0 + $0x68] sm:$0xff] }
 0xa32   :  { %2480 = vtanh.f32 %v599_v2 }
 0xa3c   :  { %v2481_v9 = vpop.eup %2480 }
 0xa3d   :  { %602 = vrot.lane.b32.xlu0 %v2481_v9, %s2613_s11 }
 0xaaf   :  { %v603_v11 = vpop.permute.xlu0 %602 }
 0xab0   :  { %v2835_v12 = vmul.f32 %v2479_v60, %v603_v11 }
 0xab2   :  { %v614_v13 = vpack.c.bf16 %v2835_v12, %v2835_v12 }
 0xab4   :  { %616 = vrot.lane.b32.xlu1 %v614_v13, %s2614_s3 }
 0xb26   :  { %v617_v23 = vpop.permute.xlu1 %616 }
 0xb27   :  { %2266 = vmatmul.mubr.msk.bf16.vlgmr.msra.gmra.mrb[16].mxu1 %vm298_vm1, %v617_v23 }
 0xb28   :  { %2270 = vmatpush3.bf16.msra.mxu1 %v2698_v10  ;;  %2273 = vmatprep.mubr.msk.bf16.mxu1 %vm2611_vm0, %v2610_v1 }
 0xb29   :  { %2271 = vmatprep.subr.bf16.mxu1 %v2610_v1 }
 0xb2c   :  { %2272 = vmatpush3.bf16.msra.mxu1 %v2717_v16 }
 0xb2d   :  { %2277 = vmatprep.subr.bf16.mxu1 %v2610_v1 }
 0xbfa   :  { %v655_v25 = vpop.f32.mrb[16].mxu1 }
 0xbfb   :  { %v661_v26 = vadd.f32 %v655_v25, %v253_v24  ;;  %v2267_v27 = vpop.f32.mrb[17].mxu1 }
 0xbfc   :  { %v658_v28 = vpop.f32.mrb[18].mxu1 }
 0xbfd   :  { %2482 = vtanh.f32 %v661_v26  ;;  %v2268_v29 = vpop.f32.mrb[19].mxu1  ;;  %v2069_v31 = vmul.f32 -1.442695, %v661_v26 }
 0xbff   :  { %2484 = vpow2.f32 %v2069_v31 }
 0xc07   :  { %v2483_v30 = vpop.eup %2482 }
 0xc08   :  { %671 = vrot.lane.b32.xlu0 %v2483_v30, %s2613_s11 }
 0xc09   :  { %v2485_v33 = vpop.eup %2484 }
 0xc0a   :  { %v665_v34 = vadd.f32 1.0, %v2485_v33 }
 0xc0c   :  { %2486 = vrcp.f32 %v665_v34 }
 0xc16   :  { %v2487_v35 = vpop.eup %2486 }
 0xc17   :  { %v669_v38 = vmul.f32 %v2487_v35, %v599_v2  ;;  %v85_v2 = vld [vmem:[%s3176_s0 + $0x78] sm:$0xff] }
 0xc18   :  { %v97_v4 = vpack.c.bf16 %v85_v2, %v83_v0  ;;  %v86_v0 = vld [vmem:[%s3176_s0 + $0x80] sm:$0xff] }
 0xc1a   :  { %258 = vmatprep.mubr.bf16.mxu0 %v97_v4  ;;  %v98_v4 = vpack.c.bf16 %v88_v3, %v86_v0 }
 0xc1b   :  { %259 = vmatmul.mubr.bf16.gmra.mrb[12].mxu0 %v96_v6 }
 0xc7a   :  { %v672_v36 = vpop.permute.xlu0 %671 }
 0xc7b   :  { %v674_v37 = vmul.f32 %v2487_v35, %v672_v36 }
 0xc7d   :  { %676 = vrot.lane.b32.xlu1 %v674_v37, %s2613_s11 }
 0xcee   :  { %v2147_v13 = vpop.f32.mrb[12].mxu0 }
 0xcef   :  { %v677_v39 = vpop.permute.xlu1 %676  ;;  %v2148_v14 = vpop.f32.mrb[13].mxu0 }
 0xcf0   :  { %v679_v40 = vadd.f32 %v677_v39, %v669_v38  ;;  %v2149_v15 = vadd.f32 %v2148_v14, %v2147_v13  ;;  %v2150_v18 = vpop.f32.mrb[14].mxu0 }
 0xcf1   :  { %v2151_v19 = vpop.f32.mrb[15].mxu0 }
 0xcf2   :  { %2488 = vtanh.f32 %v679_v40  ;;  %v2152_v20 = vadd.f32 %v2151_v19, %v2150_v18  ;;  %v261_v23 = vadd.f32 %v2149_v15, %v2757_v32 }
 0xcfc   :  { %v2489_v41 = vpop.eup %2488 }
 0xcfd   :  { %682 = vrot.lane.b32.xlu0 %v2489_v41, %s2613_s11 }
 0xd6f   :  { %v683_v42 = vpop.permute.xlu0 %682 }
 0xd70   :  { %v2851_v43 = vmul.f32 %v2487_v35, %v683_v42 }
 0xd72   :  { %v694_v44 = vpack.c.bf16 %v2851_v43, %v2851_v43 }
 0xd74   :  { %696 = vrot.lane.b32.xlu1 %v694_v44, %s2614_s3 }
 0xde6   :  { %v697_v45 = vpop.permute.xlu1 %696 }
 0xde7   :  { %2274 = vmatmul.mubr.msk.bf16.vlgmr.msra.gmra.mrb[20].mxu1 %vm298_vm1, %v697_v45 }
 0xde8   :  { %2278 = vmatpush3.bf16.msra.mxu1 %v2698_v10  ;;  %2281 = vmatprep.mubr.msk.bf16.mxu1 %vm2611_vm0, %v2610_v1 }
 0xde9   :  { %2279 = vmatprep.subr.bf16.mxu1 %v2610_v1 }
 0xdec   :  { %2280 = vmatpush3.bf16.msra.mxu1 %v2717_v16 }
 0xded   :  { %2285 = vmatprep.subr.bf16.mxu1 %v2610_v1 }
 0xeba   :  { %v735_v48 = vpop.f32.mrb[20].mxu1 }
 0xebb   :  { %v741_v49 = vadd.f32 %v735_v48, %v256_v47  ;;  %v2275_v50 = vpop.f32.mrb[21].mxu1  ;;  %v264_v47 = vadd.f32 %v2152_v20, %v2757_v32 }
 0xebc   :  { %v738_v52 = vpop.f32.mrb[22].mxu1 }
 0xebd   :  { %2490 = vtanh.f32 %v741_v49  ;;  %v2276_v53 = vpop.f32.mrb[23].mxu1  ;;  %v2071_v55 = vmul.f32 -1.442695, %v741_v49 }
 0xebf   :  { %2492 = vpow2.f32 %v2071_v55 }
 0xec7   :  { %v2491_v54 = vpop.eup %2490 }
 0xec8   :  { %751 = vrot.lane.b32.xlu0 %v2491_v54, %s2613_s11 }
 0xec9   :  { %v2493_v56 = vpop.eup %2492 }
 0xeca   :  { %v745_v57 = vadd.f32 1.0, %v2493_v56 }
 0xecc   :  { %2494 = vrcp.f32 %v745_v57 }
 0xed6   :  { %v2495_v58 = vpop.eup %2494 }
 0xed7   :  { %v749_v61 = vmul.f32 %v2495_v58, %v679_v40 }
 0xf3a   :  { %v752_v59 = vpop.permute.xlu0 %751 }
 0xf3b   :  { %v754_v60 = vmul.f32 %v2495_v58, %v752_v59 }
 0xf3d   :  { %756 = vrot.lane.b32.xlu1 %v754_v60, %s2613_s11 }
 0xfaf   :  { %v757_v62 = vpop.permute.xlu1 %756 }
 0xfb0   :  { %v759_v63 = vadd.f32 %v757_v62, %v749_v61  ;;  %v87_v62 = vld [vmem:[%s3176_s0 + $0x88] sm:$0xff] }
 0xfb2   :  { %2496 = vtanh.f32 %v759_v63 }
 0xfbc   :  { %v2497_v7 = vpop.eup %2496 }
 0xfbd   :  { %762 = vrot.lane.b32.xlu0 %v2497_v7, %s2613_s11 }
0x102f   :  { %v763_v8 = vpop.permute.xlu0 %762 }
0x1030   :  { %v2879_v9 = vmul.f32 %v2495_v58, %v763_v8 }
0x1032   :  { %v774_v11 = vpack.c.bf16 %v2879_v9, %v2879_v9 }
0x1034   :  { %776 = vrot.lane.b32.xlu1 %v774_v11, %s2614_s3 }
0x10a6   :  { %v777_v22 = vpop.permute.xlu1 %776 }
0x10a7   :  { %2282 = vmatmul.mubr.msk.bf16.vlgmr.msra.gmra.mrb[24].mxu1 %vm298_vm1, %v777_v22 }
0x10a8   :  { %2286 = vmatpush3.bf16.msra.mxu1 %v2698_v10  ;;  %2289 = vmatprep.mubr.msk.bf16.mxu1 %vm2611_vm0, %v2610_v1 }
0x10a9   :  { %2287 = vmatprep.subr.bf16.mxu1 %v2610_v1 }
0x10ac   :  { %2288 = vmatpush3.bf16.msra.mxu1 %v2717_v16 }
0x10ad   :  { %2301 = vmatprep.subr.bf16.mxu1 %v2610_v1 }
0x117a   :  { %v815_v24 = vpop.f32.mrb[24].mxu1 }
0x117b   :  { %v821_v25 = vadd.f32 %v815_v24, %v261_v23  ;;  %v2283_v26 = vpop.f32.mrb[25].mxu1 }
0x117c   :  { %v818_v27 = vpop.f32.mrb[26].mxu1 }
0x117d   :  { %2498 = vtanh.f32 %v821_v25  ;;  %v2284_v28 = vpop.f32.mrb[27].mxu1  ;;  %v2073_v30 = vmul.f32 -1.442695, %v821_v25 }
0x117f   :  { %2500 = vpow2.f32 %v2073_v30 }
0x1187   :  { %v2499_v29 = vpop.eup %2498 }
0x1188   :  { %831 = vrot.lane.b32.xlu0 %v2499_v29, %s2613_s11 }
0x1189   :  { %v2501_v31 = vpop.eup %2500 }
0x118a   :  { %v825_v33 = vadd.f32 1.0, %v2501_v31 }
0x118c   :  { %2502 = vrcp.f32 %v825_v33 }
0x1196   :  { %v2503_v34 = vpop.eup %2502 }
0x1197   :  { %v829_v37 = vmul.f32 %v2503_v34, %v759_v63  ;;  %v89_v63 = vld [vmem:[%s3176_s0 + $0x98] sm:$0xff] }
0x1198   :  { %v99_v2 = vpack.c.bf16 %v89_v63, %v87_v62  ;;  %v2999_v62 = vld [vmem:[%s3180_s6] ss:$0 sm:$0xff] }
0x119a   :  { %266 = vmatprep.mubr.bf16.mxu0 %v99_v2 }
0x119b   :  { %267 = vmatmul.mubr.bf16.gmra.mrb[16].mxu0 %v98_v4 }
0x119c   :  { %2297 = vmatprep.mubr.msk.bf16.mxu0 %vm2611_vm0, %v2610_v1 }
0x11fa   :  { %v832_v35 = vpop.permute.xlu0 %831 }
0x11fb   :  { %v834_v36 = vmul.f32 %v2503_v34, %v832_v35 }
0x11fd   :  { %836 = vrot.lane.b32.xlu1 %v834_v36, %s2613_s11 }
0x126e   :  { %v2153_v11 = vpop.f32.mrb[16].mxu0 }
0x126f   :  { %v837_v38 = vpop.permute.xlu1 %836  ;;  %v2154_v13 = vpop.f32.mrb[17].mxu0 }
0x1270   :  { %v839_v39 = vadd.f32 %v837_v38, %v829_v37  ;;  %v2155_v14 = vadd.f32 %v2154_v13, %v2153_v11  ;;  %v2156_v15 = vpop.f32.mrb[18].mxu0 }
0x1271   :  { %v2157_v18 = vpop.f32.mrb[19].mxu0 }
0x1272   :  { %2504 = vtanh.f32 %v839_v39  ;;  %v2930_v19 = vadd.f32 %v2157_v18, %v2156_v15  ;;  %v269_v22 = vadd.f32 %v2155_v14, %v2757_v32 }
0x127c   :  { %v2505_v40 = vpop.eup %2504 }
0x127d   :  { %842 = vrot.lane.b32.xlu0 %v2505_v40, %s2613_s11  ;;  %v2444_v40 = vld [vmem:[%s3178_s4] sm:$0xff]  }
0x12ef   :  { %v843_v41 = vpop.permute.xlu0 %842 }
0x12f0   :  { %v2895_v42 = vmul.f32 %v2503_v34, %v843_v41  ;;  %v2445_v41 = vld [vmem:[%s3178_s4 + $0x8] sm:$0xff]  }
0x12f2   :  { %v854_v44 = vpack.c.bf16 %v2895_v42, %v2895_v42 }
0x12f4   :  { %856 = vrot.lane.b32.xlu1 %v854_v44, %s2614_s3 }
0x1366   :  { %v857_v45 = vpop.permute.xlu1 %856 }
0x1367   :  { %2290 = vmatmul.mubr.msk.bf16.vlgmr.msra.gmra.mrb[28].mxu1 %vm298_vm1, %v857_v45 }
0x1368   :  { %2302 = vmatpush3.bf16.msra.mxu1 %v2698_v10  ;;  %2305 = vmatprep.mubr.msk.bf16.mxu1 %vm2611_vm0, %v2610_v1 }
0x1369   :  { %2303 = vmatprep.subr.bf16.mxu1 %v2610_v1 }
0x136c   :  { %2304 = vmatpush3.bf16.msra.mxu1 %v2717_v16 }
0x136d   :  { %2333 = vmatprep.subr.bf16.mxu1 %v2610_v1 }
0x143a   :  { %v895_v48 = vpop.f32.mrb[28].mxu1 }
0x143b   :  { %v901_v49 = vadd.f32 %v895_v48, %v264_v47  ;;  %v2291_v50 = vpop.f32.mrb[29].mxu1 }
0x143c   :  { %v898_v52 = vpop.f32.mrb[30].mxu1 }
0x143d   :  { %2506 = vtanh.f32 %v901_v49  ;;  %v2292_v53 = vpop.f32.mrb[31].mxu1  ;;  %v2075_v10 = vmul.f32 -1.442695, %v901_v49 }
0x143e   :  { %v2964_v53 = vld [vmem:[%s3179_s5] sm:$0xff]  }
0x143f   :  { %2508 = vpow2.f32 %v2075_v10 }
0x1447   :  { %v2507_v54 = vpop.eup %2506 }
0x1448   :  { %911 = vrot.lane.b32.xlu0 %v2507_v54, %s2613_s11 }
0x1449   :  { %v2509_v55 = vpop.eup %2508 }
0x144a   :  { %v905_v56 = vadd.f32 1.0, %v2509_v55 }
0x144c   :  { %2510 = vrcp.f32 %v905_v56 }
0x1456   :  { %v2511_v57 = vpop.eup %2510 }
0x1457   :  { %v909_v59 = vmul.f32 %v2511_v57, %v839_v39 }
0x14ba   :  { %v912_v16 = vpop.permute.xlu0 %911 }
0x14bb   :  { %v914_v58 = vmul.f32 %v2511_v57, %v912_v16  ;;  %v272_v16 = vadd.f32 %v2930_v19, %v2757_v32 }
0x14bd   :  { %916 = vrot.lane.b32.xlu1 %v914_v58, %s2613_s11 }
0x152f   :  { %v917_v60 = vpop.permute.xlu1 %916 }
0x1530   :  { %v919_v61 = vadd.f32 %v917_v60, %v909_v59 }
0x1532   :  { %2512 = vtanh.f32 %v919_v61 }
0x153c   :  { %v2513_v5 = vpop.eup %2512 }
0x153d   :  { %922 = vrot.lane.b32.xlu0 %v2513_v5, %s2613_s11 }
0x15af   :  { %v923_v6 = vpop.permute.xlu0 %922 }
0x15b0   :  { %v2925_v7 = vmul.f32 %v2511_v57, %v923_v6 }
0x15b2   :  { %v934_v8 = vpack.c.bf16 %v2925_v7, %v2925_v7 }
0x15b4   :  { %936 = vrot.lane.b32.xlu1 %v934_v8, %s2614_s3 }
0x1626   :  { %v937_v20 = vpop.permute.xlu1 %936 }
0x1627   :  { %2298 = vmatmul.mubr.msk.bf16.vlgmr.msra.gmra.mrb[20].mxu0 %vm298_vm1, %v937_v20 }
0x1628   :  { %2313 = vmatprep.mubr.msk.bf16.mxu0 %vm2611_vm0, %v2610_v1  ;;  %2310 = vmatpush3.bf16.msra.mxu0 %v2444_v40 }
0x1629   :  { %2311 = vmatprep.subr.bf16.mxu0 %v2610_v1 }
0x162c   :  { %2312 = vmatpush3.bf16.msra.mxu0 %v2445_v41 }
0x162d   :  { %2373 = vmatprep.subr.bf16.mxu0 %v2610_v1 }
0x16fa   :  { %v975_v23 = vpop.f32.mrb[20].mxu0 }
0x16fb   :  { %v981_v24 = vadd.f32 %v975_v23, %v269_v22  ;;  %v2299_v25 = vpop.f32.mrb[21].mxu0 }
0x16fc   :  { %v978_v26 = vpop.f32.mrb[22].mxu0 }
0x16fd   :  { %2514 = vtanh.f32 %v981_v24  ;;  %v2300_v27 = vpop.f32.mrb[23].mxu0  ;;  %v2077_v29 = vmul.f32 -1.442695, %v981_v24 }
0x16ff   :  { %2516 = vpow2.f32 %v2077_v29 }
0x1707   :  { %v2515_v28 = vpop.eup %2514 }
0x1708   :  { %991 = vrot.lane.b32.xlu0 %v2515_v28, %s2613_s11 }
0x1709   :  { %v2517_v30 = vpop.eup %2516 }
0x170a   :  { %v985_v31 = vadd.f32 1.0, %v2517_v30 }
0x170c   :  { %2518 = vrcp.f32 %v985_v31 }
0x1716   :  { %v2519_v33 = vpop.eup %2518 }
0x1717   :  { %v989_v36 = vmul.f32 %v2519_v33, %v919_v61 }
0x177a   :  { %v992_v34 = vpop.permute.xlu0 %991 }
0x177b   :  { %v994_v35 = vmul.f32 %v2519_v33, %v992_v34 }
0x177d   :  { %996 = vrot.lane.b32.xlu1 %v994_v35, %s2613_s11 }
0x1781   :  { %368 = vrot.lane.b32.xlu1 %v2763_v51, %s2614_s3 }
0x17ef   :  { %v997_v37 = vpop.permute.xlu1 %996 }
0x17f0   :  { %v2940_v38 = vadd.f32 %v997_v37, %v989_v36 }
0x17f2   :  { %2520 = vtanh.f32 %v2940_v38 }
0x17f3   :  { %v369_v39 = vpop.permute.xlu1 %368 }
0x17f4   :  { %371 = vst.msk [vmem:[#allocation3] sm:$0xff] %vm298_vm1, %v369_v39 }
0x17fb   :  { %v1101_v49 = vld [vmem:[#allocation3] sm:$0xff] }
0x17fc   :  { %v2521_v51 = vpop.eup %2520 }
0x17fd   :  { %1002 = vrot.lane.b32.xlu0 %v2521_v51, %s2613_s11 }
0x1801   :  { %447 = vrot.lane.b32.xlu0 %v2791_v17, %s2614_s3  ;;  %v2974_v17 = vld [vmem:[%s3179_s5 + $0x8] sm:$0xff]  }
0x186f   :  { %v1003_v44 = vpop.permute.xlu0 %1002 }
0x1870   :  { %v2955_v45 = vmul.f32 %v2519_v33, %v1003_v44 }
0x1872   :  { %v1014_v47 = vpack.c.bf16 %v2955_v45, %v2955_v45 }
0x1873   :  { %v448_v48 = vpop.permute.xlu0 %447 }
0x1874   :  { %451 = vst.msk [vmem:[#allocation3 + $0x8] sm:$0xff] %vm298_vm1, %v448_v48  ;;  %1016 = vrot.lane.b32.xlu1 %v1014_v47, %s2614_s3 }
0x187b   :  { %v1102_v50 = vld [vmem:[#allocation3 + $0x8] sm:$0xff] }
0x187c   :  { %v1111_v52 = vpack.c.bf16 %v1102_v50, %v1101_v49 }
0x187e   :  { %2314 = vmatmul.mubr.msk.bf16.vlgmr.msra.gmra.mrb[24].mxu0 %vm298_vm1, %v1111_v52 }
0x187f   :  { %2317 = vmatprep.mubr.msk.bf16.mxu0 %vm2611_vm0, %v2610_v1  ;;  %2374 = vmatpush3.bf16.msra.mxu0 %v2964_v53 }
0x1880   :  { %2375 = vmatprep.subr.bf16.mxu0 %v2610_v1 }
0x1883   :  { %2376 = vmatpush3.bf16.msra.mxu0 %v2974_v17 }
0x1884   :  { %2389 = vmatprep.subr.bf16.mxu0 %v2610_v1 }
0x18e6   :  { %v1017_v54 = vpop.permute.xlu1 %1016 }
0x18e7   :  { %2306 = vmatmul.mubr.msk.bf16.vlgmr.msra.gmra.mrb[32].mxu1 %vm298_vm1, %v1017_v54 }
0x18e8   :  { %2334 = vmatpush3.bf16.msra.mxu1 %v2964_v53  ;;  %2337 = vmatprep.mubr.msk.bf16.mxu1 %vm2611_vm0, %v2610_v1 }
0x18e9   :  { %2335 = vmatprep.subr.bf16.mxu1 %v2610_v1 }
0x18ec   :  { %2336 = vmatpush3.bf16.msra.mxu1 %v2974_v17 }
0x18ed   :  { %2341 = vmatprep.subr.bf16.mxu1 %v2610_v1 }
0x18ef   :  { %2338 = vmatmul.mubr.bf16.vlgmr.msra.gmra.mrb[36].mxu1 %v2612_v21 }
0x18f0   :  { %2342 = vmatpush3.bf16.msra.mxu1 %v2964_v53  ;;  %2345 = vmatprep.mubr.msk.bf16.mxu1 %vm2611_vm0, %v2610_v1 }
0x18f1   :  { %2343 = vmatprep.subr.bf16.mxu1 %v2610_v1 }
0x18f4   :  { %2344 = vmatpush3.bf16.msra.mxu1 %v2974_v17 }
0x18f5   :  { %2349 = vmatprep.subr.bf16.mxu1 %v2610_v1 }
0x1951   :  { %v1183_v10 = vpop.f32.mrb[24].mxu0 }
0x1952   :  { %v2315_v55 = vpop.f32.mrb[25].mxu0  ;;  %v1184_v63 = vadd.f32 %v2999_v62, %v1183_v10 }
0x1953   :  { %v1186_v56 = vpop.f32.mrb[26].mxu0 }
0x1954   :  { %v2316_v57 = vpop.f32.mrb[27].mxu0  ;;  %v1187_v27 = vadd.f32 %v2999_v62, %v1186_v56 }
0x19ba   :  { %v1055_v58 = vpop.f32.mrb[32].mxu1 }
0x19bb   :  { %v2994_v21 = vadd.f32 %v1055_v58, %v272_v16  ;;  %v2307_v59 = vpop.f32.mrb[33].mxu1 }
0x19bc   :  { %v1058_v60 = vpop.f32.mrb[34].mxu1 }
0x19bd   :  { %v2308_v61 = vpop.f32.mrb[35].mxu1 }
0x19c2   :  { %v1279_v0 = vpop.f32.mrb[36].mxu1 }
0x19c3   :  { %v1285_v2 = vadd.f32 %v1279_v0, %v1184_v63  ;;  %v2339_v3 = vpop.f32.mrb[37].mxu1 }
0x19c4   :  { %v1282_v4 = vpop.f32.mrb[38].mxu1 }
0x19c5   :  { %2522 = vtanh.f32 %v1285_v2  ;;  %v2340_v5 = vpop.f32.mrb[39].mxu1  ;;  %v2090_v6 = vmul.f32 -1.442695, %v1285_v2 }
0x19c7   :  { %2524 = vpow2.f32 %v2090_v6 }
0x19cf   :  { %v2523_v32 = vpop.eup %2522 }
0x19d0   :  { %1295 = vrot.lane.b32.xlu0 %v2523_v32, %s2613_s11 }
0x19d1   :  { %v2525_v8 = vpop.eup %2524 }
0x19d2   :  { %v1289_v11 = vadd.f32 1.0, %v2525_v8 }
0x19d4   :  { %2526 = vrcp.f32 %v1289_v11 }
0x19de   :  { %v2527_v13 = vpop.eup %2526 }
0x19df   :  { %v1293_v18 = vmul.f32 0.0, %v2527_v13 }
0x1a42   :  { %v1296_v14 = vpop.permute.xlu0 %1295 }
0x1a43   :  { %v1298_v15 = vmul.f32 %v2527_v13, %v1296_v14 }
0x1a45   :  { %1300 = vrot.lane.b32.xlu1 %v1298_v15, %s2613_s11 }
0x1ab7   :  { %v1301_v19 = vpop.permute.xlu1 %1300 }
0x1ab8   :  { %v1303_v20 = vadd.f32 %v1301_v19, %v1293_v18 }
0x1aba   :  { %2528 = vtanh.f32 %v1303_v20 }
0x1ac4   :  { %v2529_v22 = vpop.eup %2528 }
0x1ac5   :  { %1306 = vrot.lane.b32.xlu0 %v2529_v22, %s2613_s11 }
0x1b37   :  { %v1307_v23 = vpop.permute.xlu0 %1306 }
0x1b38   :  { %v1309_v24 = vmul.f32 %v2527_v13, %v1307_v23 }
0x1b3a   :  { %v1311_v25 = vpack.c.bf16 %v1309_v24, %v1309_v24 }
0x1b3c   :  { %1313 = vrot.lane.b32.xlu1 %v1311_v25, %s2614_s3 }
0x1bae   :  { %v1314_v26 = vpop.permute.xlu1 %1313 }
0x1baf   :  { %2346 = vmatmul.mubr.msk.bf16.vlgmr.msra.gmra.mrb[40].mxu1 %vm298_vm1, %v1314_v26 }
0x1bb0   :  { %2350 = vmatpush3.bf16.msra.mxu1 %v2964_v53  ;;  %2353 = vmatprep.mubr.msk.bf16.mxu1 %vm2611_vm0, %v2610_v1 }
0x1bb1   :  { %2351 = vmatprep.subr.bf16.mxu1 %v2610_v1 }
0x1bb4   :  { %2352 = vmatpush3.bf16.msra.mxu1 %v2974_v17 }
0x1bb5   :  { %2357 = vmatprep.subr.bf16.mxu1 %v2610_v1 }
0x1c82   :  { %v1352_v28 = vpop.f32.mrb[40].mxu1 }
0x1c83   :  { %v1358_v29 = vadd.f32 %v1352_v28, %v1187_v27  ;;  %v2347_v30 = vpop.f32.mrb[41].mxu1 }
0x1c84   :  { %v1355_v31 = vpop.f32.mrb[42].mxu1 }
0x1c85   :  { %2530 = vtanh.f32 %v1358_v29  ;;  %v2348_v33 = vpop.f32.mrb[43].mxu1  ;;  %v2092_v35 = vmul.f32 -1.442695, %v1358_v29 }
0x1c87   :  { %2532 = vpow2.f32 %v2092_v35 }
0x1c8f   :  { %v2531_v34 = vpop.eup %2530 }
0x1c90   :  { %1368 = vrot.lane.b32.xlu0 %v2531_v34, %s2613_s11 }
0x1c91   :  { %v2533_v36 = vpop.eup %2532 }
0x1c92   :  { %v1362_v37 = vadd.f32 1.0, %v2533_v36 }
0x1c94   :  { %2534 = vrcp.f32 %v1362_v37 }
0x1c9e   :  { %v2535_v39 = vpop.eup %2534 }
0x1c9f   :  { %v1366_v51 = vmul.f32 %v2535_v39, %v1303_v20 }
0x1d02   :  { %v1369_v40 = vpop.permute.xlu0 %1368 }
0x1d03   :  { %v1371_v41 = vmul.f32 %v2535_v39, %v1369_v40 }
0x1d05   :  { %1373 = vrot.lane.b32.xlu1 %v1371_v41, %s2613_s11 }
0x1d09   :  { %527 = vrot.lane.b32.xlu1 %v2807_v46, %s2614_s3 }
0x1d77   :  { %v1374_v44 = vpop.permute.xlu1 %1373 }
0x1d78   :  { %v1376_v47 = vadd.f32 %v1374_v44, %v1366_v51 }
0x1d7a   :  { %2536 = vtanh.f32 %v1376_v47 }
0x1d7b   :  { %v528_v48 = vpop.permute.xlu1 %527 }
0x1d7c   :  { %531 = vst.msk [vmem:[#allocation3 + $0x10] sm:$0xff] %vm298_vm1, %v528_v48 }
0x1d83   :  { %v1103_v46 = vld [vmem:[#allocation3 + $0x10] sm:$0xff] }
0x1d84   :  { %v2537_v49 = vpop.eup %2536 }
0x1d85   :  { %1379 = vrot.lane.b32.xlu0 %v2537_v49, %s2613_s11 }
0x1d89   :  { %607 = vrot.lane.b32.xlu0 %v2835_v12, %s2614_s3 }
0x1df7   :  { %v1380_v50 = vpop.permute.xlu0 %1379 }
0x1df8   :  { %v1382_v52 = vmul.f32 %v2535_v39, %v1380_v50 }
0x1dfa   :  { %v1384_v54 = vpack.c.bf16 %v1382_v52, %v1382_v52 }
0x1dfb   :  { %v608_v10 = vpop.permute.xlu0 %607 }
0x1dfc   :  { %611 = vst.msk [vmem:[#allocation3 + $0x18] sm:$0xff] %vm298_vm1, %v608_v10  ;;  %1386 = vrot.lane.b32.xlu1 %v1384_v54, %s2614_s3 }
0x1e03   :  { %v1104_v55 = vld [vmem:[#allocation3 + $0x18] sm:$0xff] }
0x1e04   :  { %v1112_v56 = vpack.c.bf16 %v1104_v55, %v1103_v46 }
0x1e06   :  { %2318 = vmatmul.mubr.msk.bf16.gmra.mrb[28].mxu0 %vm298_vm1, %v1112_v56 }
0x1e07   :  { %2321 = vmatprep.mubr.msk.bf16.mxu0 %vm2611_vm0, %v2610_v1 }
0x1e6e   :  { %v1387_v57 = vpop.permute.xlu1 %1386 }
0x1e6f   :  { %2354 = vmatmul.mubr.msk.bf16.vlgmr.msra.gmra.mrb[44].mxu1 %vm298_vm1, %v1387_v57 }
0x1e70   :  { %2358 = vmatpush3.bf16.msra.mxu1 %v2964_v53  ;;  %2361 = vmatprep.mubr.msk.bf16.mxu1 %vm2611_vm0, %v2610_v1 }
0x1e71   :  { %2359 = vmatprep.subr.bf16.mxu1 %v2610_v1 }
0x1e74   :  { %2360 = vmatpush3.bf16.msra.mxu1 %v2974_v17 }
0x1e75   :  { %2365 = vmatprep.subr.bf16.mxu1 %v2610_v1 }
0x1ed9   :  { %v1191_v12 = vpop.f32.mrb[28].mxu0 }
0x1eda   :  { %v2319_v16 = vpop.f32.mrb[29].mxu0  ;;  %v1192_v60 = vadd.f32 %v2999_v62, %v1191_v12 }
0x1edb   :  { %v1194_v58 = vpop.f32.mrb[30].mxu0 }
0x1edc   :  { %v2320_v59 = vpop.f32.mrb[31].mxu0  ;;  %v1195_v25 = vadd.f32 %v2999_v62, %v1194_v58 }
0x1f42   :  { %v1425_v61 = vpop.f32.mrb[44].mxu1 }
0x1f43   :  { %v1431_v63 = vadd.f32 %v1425_v61, %v1192_v60  ;;  %v2355_v0 = vpop.f32.mrb[45].mxu1 }
0x1f44   :  { %v1428_v2 = vpop.f32.mrb[46].mxu1 }
0x1f45   :  { %2538 = vtanh.f32 %v1431_v63  ;;  %v2356_v3 = vpop.f32.mrb[47].mxu1  ;;  %v2094_v5 = vmul.f32 -1.442695, %v1431_v63 }
0x1f47   :  { %2540 = vpow2.f32 %v2094_v5 }
0x1f4f   :  { %v2539_v4 = vpop.eup %2538 }
0x1f50   :  { %1441 = vrot.lane.b32.xlu0 %v2539_v4, %s2613_s11 }
0x1f51   :  { %v2541_v32 = vpop.eup %2540 }
0x1f52   :  { %v1435_v6 = vadd.f32 1.0, %v2541_v32 }
0x1f54   :  { %2542 = vrcp.f32 %v1435_v6 }
0x1f5e   :  { %v2543_v8 = vpop.eup %2542 }
0x1f5f   :  { %v1439_v14 = vmul.f32 %v2543_v8, %v1376_v47 }
0x1fc2   :  { %v1442_v11 = vpop.permute.xlu0 %1441 }
0x1fc3   :  { %v1444_v13 = vmul.f32 %v2543_v8, %v1442_v11 }
0x1fc5   :  { %1446 = vrot.lane.b32.xlu1 %v1444_v13, %s2613_s11 }
0x2037   :  { %v1447_v15 = vpop.permute.xlu1 %1446 }
0x2038   :  { %v1449_v18 = vadd.f32 %v1447_v15, %v1439_v14 }
0x203a   :  { %2544 = vtanh.f32 %v1449_v18 }
0x2044   :  { %v2545_v19 = vpop.eup %2544 }
0x2045   :  { %1452 = vrot.lane.b32.xlu0 %v2545_v19, %s2613_s11 }
0x20b7   :  { %v1453_v20 = vpop.permute.xlu0 %1452 }
0x20b8   :  { %v1455_v22 = vmul.f32 %v2543_v8, %v1453_v20 }
0x20ba   :  { %v1457_v23 = vpack.c.bf16 %v1455_v22, %v1455_v22 }
0x20bc   :  { %1459 = vrot.lane.b32.xlu1 %v1457_v23, %s2614_s3 }
0x212e   :  { %v1460_v24 = vpop.permute.xlu1 %1459 }
0x212f   :  { %2362 = vmatmul.mubr.msk.bf16.vlgmr.msra.gmra.mrb[48].mxu1 %vm298_vm1, %v1460_v24 }
0x2130   :  { %2366 = vmatpush3.bf16.msra.mxu1 %v2964_v53  ;;  %2369 = vmatprep.mubr.msk.bf16.mxu1 %vm2611_vm0, %v2610_v1 }
0x2131   :  { %2367 = vmatprep.subr.bf16.mxu1 %v2610_v1 }
0x2134   :  { %2368 = vmatpush3.bf16.msra.mxu1 %v2974_v17 }
0x2135   :  { %2381 = vmatprep.subr.bf16.mxu1 %v2610_v1 }
0x2202   :  { %v1498_v26 = vpop.f32.mrb[48].mxu1 }
0x2203   :  { %v1504_v27 = vadd.f32 %v1498_v26, %v1195_v25  ;;  %v2363_v28 = vpop.f32.mrb[49].mxu1 }
0x2204   :  { %v1501_v29 = vpop.f32.mrb[50].mxu1 }
0x2205   :  { %2546 = vtanh.f32 %v1504_v27  ;;  %v2364_v30 = vpop.f32.mrb[51].mxu1  ;;  %v2096_v33 = vmul.f32 -1.442695, %v1504_v27 }
0x2207   :  { %2548 = vpow2.f32 %v2096_v33 }
0x220f   :  { %v2547_v31 = vpop.eup %2546 }
0x2210   :  { %1514 = vrot.lane.b32.xlu0 %v2547_v31, %s2613_s11 }
0x2211   :  { %v2549_v34 = vpop.eup %2548 }
0x2212   :  { %v1508_v35 = vadd.f32 1.0, %v2549_v34 }
0x2214   :  { %2550 = vrcp.f32 %v1508_v35 }
0x221e   :  { %v2551_v36 = vpop.eup %2550 }
0x221f   :  { %v1512_v40 = vmul.f32 %v2551_v36, %v1449_v18 }
0x2282   :  { %v1515_v37 = vpop.permute.xlu0 %1514 }
0x2283   :  { %v1517_v39 = vmul.f32 %v2551_v36, %v1515_v37 }
0x2285   :  { %1519 = vrot.lane.b32.xlu1 %v1517_v39, %s2613_s11 }
0x2289   :  { %687 = vrot.lane.b32.xlu1 %v2851_v43, %s2614_s3  ;;  %v2079_v43 = vmul.f32 -1.442695, %v2994_v21 }
0x22f7   :  { %v1520_v41 = vpop.permute.xlu1 %1519 }
0x22f8   :  { %v3051_v51 = vadd.f32 %v1520_v41, %v1512_v40 }
0x22fa   :  { %2552 = vtanh.f32 %v3051_v51 }
0x22fb   :  { %v688_v44 = vpop.permute.xlu1 %687  ;;  %2554 = vtanh.f32 %v2994_v21 }
0x22fc   :  { %691 = vst.msk [vmem:[#allocation3 + $0x20] sm:$0xff] %vm298_vm1, %v688_v44  ;;  %2556 = vpow2.f32 %v2079_v43 }
0x2303   :  { %v1105_v57 = vld [vmem:[#allocation3 + $0x20] sm:$0xff] }
0x2304   :  { %v2553_v47 = vpop.eup %2552 }
0x2305   :  { %1525 = vrot.lane.b32.xlu0 %v2553_v47, %s2613_s11  ;;  %v2555_v48 = vpop.eup %2554 }
0x2306   :  { %v2557_v49 = vpop.eup %2556 }
0x2307   :  { %v1065_v50 = vadd.f32 1.0, %v2557_v49 }
0x2309   :  { %767 = vrot.lane.b32.xlu0 %v2879_v9, %s2614_s3  ;;  %2558 = vrcp.f32 %v1065_v50 }
0x230d   :  { %1071 = vrot.lane.b32.xlu0 %v2555_v48, %s2613_s11 }
0x2313   :  { %v2559_v55 = vpop.eup %2558 }
0x2314   :  { %v1069_v58 = vmul.f32 %v2559_v55, %v2940_v38 }
0x2377   :  { %v1526_v52 = vpop.permute.xlu0 %1525 }
0x2378   :  { %v1528_v54 = vmul.f32 %v2551_v36, %v1526_v52 }
0x237a   :  { %v1530_v10 = vpack.c.bf16 %v1528_v54, %v1528_v54 }
0x237b   :  { %v768_v46 = vpop.permute.xlu0 %767 }
0x237c   :  { %771 = vst.msk [vmem:[#allocation3 + $0x28] sm:$0xff] %vm298_vm1, %v768_v46  ;;  %1532 = vrot.lane.b32.xlu1 %v1530_v10, %s2614_s3 }
0x237f   :  { %v1072_v56 = vpop.permute.xlu0 %1071 }
0x2380   :  { %v1074_v9 = vmul.f32 %v2559_v55, %v1072_v56 }
0x2382   :  { %1076 = vrot.lane.b32.xlu0 %v1074_v9, %s2613_s11 }
0x2383   :  { %v1106_v12 = vld [vmem:[#allocation3 + $0x28] sm:$0xff] }
0x2384   :  { %v1113_v21 = vpack.c.bf16 %v1106_v12, %v1105_v57 }
0x2386   :  { %2322 = vmatmul.mubr.msk.bf16.gmra.mrb[32].mxu0 %vm298_vm1, %v1113_v21 }
0x2387   :  { %2325 = vmatprep.mubr.msk.bf16.mxu0 %vm2611_vm0, %v2610_v1 }
0x23ee   :  { %v1533_v16 = vpop.permute.xlu1 %1532 }
0x23ef   :  { %2370 = vmatmul.mubr.msk.bf16.vlgmr.msra.gmra.mrb[52].mxu1 %vm298_vm1, %v1533_v16 }
0x23f0   :  { %2382 = vmatpush3.bf16.msra.mxu1 %v2964_v53  ;;  %2385 = vmatprep.mubr.msk.bf16.mxu1 %vm2611_vm0, %v2610_v1 }
0x23f1   :  { %2383 = vmatprep.subr.bf16.mxu1 %v2610_v1 }
0x23f4   :  { %v1077_v59 = vpop.permute.xlu0 %1076  ;;  %2384 = vmatpush3.bf16.msra.mxu1 %v2974_v17 }
0x23f5   :  { %v1079_v60 = vadd.f32 %v1077_v59, %v1069_v58  ;;  %2397 = vmatprep.subr.bf16.mxu1 %v2610_v1 }
0x23f7   :  { %2560 = vtanh.f32 %v1079_v60 }
0x2401   :  { %v2561_v61 = vpop.eup %2560 }
0x2402   :  { %1082 = vrot.lane.b32.xlu0 %v2561_v61, %s2613_s11 }
0x2406   :  { %847 = vrot.lane.b32.xlu0 %v2895_v42, %s2614_s3 }
0x240a   :  { %1007 = vrot.lane.b32.xlu0 %v2955_v45, %s2614_s3 }
0x2459   :  { %v1199_v63 = vpop.f32.mrb[32].mxu0 }
0x245a   :  { %v2323_v0 = vpop.f32.mrb[33].mxu0  ;;  %v1200_v32 = vadd.f32 %v2999_v62, %v1199_v63 }
0x245b   :  { %v3080_v2 = vpop.f32.mrb[34].mxu0 }
0x245c   :  { %v2324_v38 = vpop.f32.mrb[35].mxu0  ;;  %v1203_v52 = vadd.f32 %v2999_v62, %v3080_v2 }
0x2474   :  { %v1083_v3 = vpop.permute.xlu0 %1082 }
0x2475   :  { %v1085_v27 = vmul.f32 %v2559_v55, %v1083_v3 }
0x2478   :  { %v848_v4 = vpop.permute.xlu0 %847 }
0x2479   :  { %851 = vst.msk [vmem:[#allocation3 + $0x30] sm:$0xff] %vm298_vm1, %v848_v4 }
0x247c   :  { %v1008_v5 = vpop.permute.xlu0 %1007 }
0x247d   :  { %1011 = vst.msk [vmem:[#allocation3 + $0x40] sm:$0xff] %vm298_vm1, %v1008_v5 }
0x2480   :  { %v1107_v34 = vld [vmem:[#allocation3 + $0x30] sm:$0xff] }
0x2484   :  { %v1109_v37 = vld [vmem:[#allocation3 + $0x40] sm:$0xff] }
0x24c2   :  { %v1571_v6 = vpop.f32.mrb[52].mxu1 }
0x24c3   :  { %v1577_v8 = vadd.f32 %v1571_v6, %v1200_v32  ;;  %v2371_v42 = vpop.f32.mrb[53].mxu1 }
0x24c4   :  { %v1574_v11 = vpop.f32.mrb[54].mxu1 }
0x24c5   :  { %2562 = vtanh.f32 %v1577_v8  ;;  %v2372_v45 = vpop.f32.mrb[55].mxu1  ;;  %v2098_v14 = vmul.f32 -1.442695, %v1577_v8 }
0x24c7   :  { %2564 = vpow2.f32 %v2098_v14 }
0x24cf   :  { %v2563_v13 = vpop.eup %2562 }
0x24d0   :  { %1587 = vrot.lane.b32.xlu1 %v2563_v13, %s2613_s11 }
0x24d1   :  { %v2565_v15 = vpop.eup %2564 }
0x24d2   :  { %v1581_v18 = vadd.f32 1.0, %v2565_v15 }
0x24d4   :  { %2566 = vrcp.f32 %v1581_v18 }
0x24de   :  { %v2567_v19 = vpop.eup %2566 }
0x24df   :  { %v1585_v23 = vmul.f32 %v2567_v19, %v3051_v51 }
0x2542   :  { %v1588_v20 = vpop.permute.xlu1 %1587 }
0x2543   :  { %v1590_v22 = vmul.f32 %v2567_v19, %v1588_v20 }
0x2545   :  { %1592 = vrot.lane.b32.xlu1 %v1590_v22, %s2613_s11 }
0x25b7   :  { %v1593_v24 = vpop.permute.xlu1 %1592 }
0x25b8   :  { %v1595_v25 = vadd.f32 %v1593_v24, %v1585_v23 }
0x25ba   :  { %2568 = vtanh.f32 %v1595_v25 }
0x25c4   :  { %v2569_v26 = vpop.eup %2568 }
0x25c5   :  { %1598 = vrot.lane.b32.xlu1 %v2569_v26, %s2613_s11 }
0x25c9   :  { %927 = vrot.lane.b32.xlu1 %v2925_v7, %s2614_s3 }
0x25cd   :  { %1087 = vrot.lane.b32.xlu1 %v1085_v27, %s2614_s3 }
0x2637   :  { %v1599_v28 = vpop.permute.xlu1 %1598 }
0x2638   :  { %v1601_v29 = vmul.f32 %v2567_v19, %v1599_v28 }
0x263a   :  { %v1603_v30 = vpack.c.bf16 %v1601_v29, %v1601_v29 }
0x263b   :  { %v928_v31 = vpop.permute.xlu1 %927 }
0x263c   :  { %931 = vst.msk [vmem:[#allocation3 + $0x38] sm:$0xff] %vm298_vm1, %v928_v31  ;;  %1605 = vrot.lane.b32.xlu0 %v1603_v30, %s2614_s3 }
0x263f   :  { %v1088_v33 = vpop.permute.xlu1 %1087 }
0x2640   :  { %1091 = vst.msk [vmem:[#allocation3 + $0x48] sm:$0xff] %vm298_vm1, %v1088_v33 }
0x2643   :  { %v1108_v35 = vld [vmem:[#allocation3 + $0x38] sm:$0xff] }
0x2644   :  { %v1114_v36 = vpack.c.bf16 %v1108_v35, %v1107_v34 }
0x2646   :  { %2326 = vmatmul.mubr.msk.bf16.gmra.mrb[36].mxu0 %vm298_vm1, %v1114_v36 }
0x2647   :  { %2329 = vmatprep.mubr.msk.bf16.mxu0 %vm2611_vm0, %v2610_v1  ;;  %v1110_v7 = vld [vmem:[#allocation3 + $0x48] sm:$0xff] }
0x2648   :  { %v1115_v39 = vpack.c.bf16 %v1110_v7, %v1109_v37 }
0x264e   :  { %2330 = vmatmul.mubr.msk.bf16.gmra.mrb[40].mxu0 %vm298_vm1, %v1115_v39 }
0x264f   :  { %2377 = vmatprep.mubr.msk.bf16.mxu0 %vm2611_vm0, %v2610_v1 }
0x26ae   :  { %v1606_v40 = vpop.permute.xlu0 %1605 }
0x26af   :  { %2378 = vmatmul.mubr.msk.bf16.vlgmr.msra.gmra.mrb[44].mxu0 %vm298_vm1, %v1606_v40 }
0x26b0   :  { %2390 = vmatpush3.bf16.msra.mxu0 %v2964_v53  ;;  %2393 = vmatprep.mubr.msk.bf16.mxu0 %vm2611_vm0, %v2610_v1 }
0x26b1   :  { %2391 = vmatprep.subr.bf16.mxu0 %v2610_v1 }
0x26b4   :  { %2392 = vmatpush3.bf16.msra.mxu0 %v2974_v17 }
0x26b5   :  { %2405 = vmatprep.subr.bf16.mxu0 %v2610_v1 }
0x2719   :  { %v1207_v41 = vpop.f32.mrb[36].mxu0 }
0x271a   :  { %v2327_v51 = vpop.f32.mrb[37].mxu0  ;;  %v1208_v5 = vadd.f32 %v2999_v62, %v1207_v41 }
0x271b   :  { %v3108_v44 = vpop.f32.mrb[38].mxu0 }
0x271c   :  { %v2328_v47 = vpop.f32.mrb[39].mxu0  ;;  %v1211_v30 = vadd.f32 %v2999_v62, %v3108_v44 }
0x2721   :  { %v3110_v48 = vpop.f32.mrb[40].mxu0 }
0x2722   :  { %v2331_v43 = vpop.f32.mrb[41].mxu0 }
0x2723   :  { %v3112_v49 = vpop.f32.mrb[42].mxu0 }
0x2724   :  { %v2332_v50 = vpop.f32.mrb[43].mxu0 }
0x2782   :  { %v1644_v54 = vpop.f32.mrb[44].mxu0 }
0x2783   :  { %v1650_v10 = vadd.f32 %v1644_v54, %v1203_v52  ;;  %v2379_v46 = vpop.f32.mrb[45].mxu0 }
0x2784   :  { %v1647_v55 = vpop.f32.mrb[46].mxu0  ;;  %v1216_v46 = vadd.f32 %v2999_v62, %v3110_v48 }
0x2785   :  { %2570 = vtanh.f32 %v1650_v10  ;;  %v2380_v56 = vpop.f32.mrb[47].mxu0  ;;  %v2100_v57 = vmul.f32 -1.442695, %v1650_v10 }
0x2787   :  { %2572 = vpow2.f32 %v2100_v57 }
0x278f   :  { %v2571_v9 = vpop.eup %2570 }
0x2790   :  { %1660 = vrot.lane.b32.xlu1 %v2571_v9, %s2613_s11 }
0x2791   :  { %v2573_v12 = vpop.eup %2572 }
0x2792   :  { %v1654_v21 = vadd.f32 1.0, %v2573_v12 }
0x2794   :  { %2574 = vrcp.f32 %v1654_v21 }
0x279e   :  { %v2575_v16 = vpop.eup %2574 }
0x279f   :  { %v1658_v60 = vmul.f32 %v2575_v16, %v1595_v25 }
0x2802   :  { %v1661_v58 = vpop.permute.xlu1 %1660 }
0x2803   :  { %v1663_v59 = vmul.f32 %v2575_v16, %v1661_v58 }
0x2805   :  { %1665 = vrot.lane.b32.xlu0 %v1663_v59, %s2613_s11 }
0x2877   :  { %v1666_v61 = vpop.permute.xlu0 %1665 }
0x2878   :  { %v1668_v63 = vadd.f32 %v1666_v61, %v1658_v60 }
0x287a   :  { %2576 = vtanh.f32 %v1668_v63 }
0x2884   :  { %v2577_v0 = vpop.eup %2576 }
0x2885   :  { %1671 = vrot.lane.b32.xlu1 %v2577_v0, %s2613_s11 }
0x28f7   :  { %v1672_v2 = vpop.permute.xlu1 %1671 }
0x28f8   :  { %v1674_v38 = vmul.f32 %v2575_v16, %v1672_v2 }
0x28fa   :  { %v1676_v3 = vpack.c.bf16 %v1674_v38, %v1674_v38 }
0x28fc   :  { %1678 = vrot.lane.b32.xlu0 %v1676_v3, %s2614_s3 }
0x296e   :  { %v1679_v4 = vpop.permute.xlu0 %1678 }
0x296f   :  { %2386 = vmatmul.mubr.msk.bf16.vlgmr.msra.gmra.mrb[56].mxu1 %vm298_vm1, %v1679_v4 }
0x2970   :  { %2398 = vmatpush3.bf16.msra.mxu1 %v2964_v53  ;;  %2401 = vmatprep.mubr.msk.bf16.mxu1 %vm2611_vm0, %v2610_v1 }
0x2971   :  { %2399 = vmatprep.subr.bf16.mxu1 %v2610_v1 }
0x2974   :  { %2400 = vmatpush3.bf16.msra.mxu1 %v2974_v17 }
0x2975   :  { %2413 = vmatprep.subr.bf16.mxu1 %v2610_v1 }
0x2a42   :  { %v1717_v32 = vpop.f32.mrb[56].mxu1 }
0x2a43   :  { %v1723_v6 = vadd.f32 %v1717_v32, %v1208_v5  ;;  %v2387_v8 = vpop.f32.mrb[57].mxu1 }
0x2a44   :  { %v1720_v42 = vpop.f32.mrb[58].mxu1 }
0x2a45   :  { %2578 = vtanh.f32 %v1723_v6  ;;  %v2388_v11 = vpop.f32.mrb[59].mxu1  ;;  %v2102_v13 = vmul.f32 -1.442695, %v1723_v6  ;;  %v1219_v6 = vadd.f32 %v2999_v62, %v3112_v49 }
0x2a47   :  { %2580 = vpow2.f32 %v2102_v13 }
0x2a4f   :  { %v2579_v45 = vpop.eup %2578 }
0x2a50   :  { %1733 = vrot.lane.b32.xlu1 %v2579_v45, %s2613_s11 }
0x2a51   :  { %v2581_v14 = vpop.eup %2580 }
0x2a52   :  { %v1727_v15 = vadd.f32 1.0, %v2581_v14 }
0x2a54   :  { %2582 = vrcp.f32 %v1727_v15 }
0x2a5e   :  { %v2583_v18 = vpop.eup %2582 }
0x2a5f   :  { %v1731_v22 = vmul.f32 %v2583_v18, %v1668_v63 }
0x2ac2   :  { %v1734_v19 = vpop.permute.xlu1 %1733 }
0x2ac3   :  { %v1736_v20 = vmul.f32 %v2583_v18, %v1734_v19 }
0x2ac5   :  { %1738 = vrot.lane.b32.xlu0 %v1736_v20, %s2613_s11 }
0x2b37   :  { %v1739_v23 = vpop.permute.xlu0 %1738 }
0x2b38   :  { %v1741_v24 = vadd.f32 %v1739_v23, %v1731_v22 }
0x2b3a   :  { %2584 = vtanh.f32 %v1741_v24 }
0x2b44   :  { %v2585_v25 = vpop.eup %2584 }
0x2b45   :  { %1744 = vrot.lane.b32.xlu1 %v2585_v25, %s2613_s11  ;;  %v2448_v25 = vld [vmem:[%s3181_s7] sm:$0xff]  }
0x2bb7   :  { %v1745_v26 = vpop.permute.xlu1 %1744 }
0x2bb8   :  { %v1747_v27 = vmul.f32 %v2583_v18, %v1745_v26  ;;  %v2449_v26 = vld [vmem:[%s3181_s7 + $0x8] sm:$0xff]  }
0x2bba   :  { %v1749_v28 = vpack.c.bf16 %v1747_v27, %v1747_v27 }
0x2bbc   :  { %1751 = vrot.lane.b32.xlu0 %v1749_v28, %s2614_s3 }
0x2c2e   :  { %v1752_v29 = vpop.permute.xlu0 %1751 }
0x2c2f   :  { %2394 = vmatmul.mubr.msk.bf16.vlgmr.msra.gmra.mrb[48].mxu0 %vm298_vm1, %v1752_v29 }
0x2c30   :  { %2406 = vmatpush3.bf16.msra.mxu0 %v2964_v53  ;;  %2409 = vmatprep.mubr.msk.bf16.mxu0 %vm2611_vm0, %v2610_v1 }
0x2c31   :  { %2407 = vmatprep.subr.bf16.mxu0 %v2610_v1 }
0x2c34   :  { %2408 = vmatpush3.bf16.msra.mxu0 %v2974_v17 }
0x2d02   :  { %v1790_v31 = vpop.f32.mrb[48].mxu0 }
0x2d03   :  { %v1796_v33 = vadd.f32 %v1790_v31, %v1211_v30  ;;  %v2395_v34 = vpop.f32.mrb[49].mxu0 }
0x2d04   :  { %v1793_v35 = vpop.f32.mrb[50].mxu0 }
0x2d05   :  { %2586 = vtanh.f32 %v1796_v33  ;;  %v2396_v36 = vpop.f32.mrb[51].mxu0  ;;  %v2104_v53 = vmul.f32 -1.442695, %v1796_v33  ;;  %v2109_v33 = vld [vmem:[%s3182_s8] ss:$0 sm:$0xff] }
0x2d07   :  { %2588 = vpow2.f32 %v2104_v53 }
0x2d0f   :  { %v2587_v7 = vpop.eup %2586 }
0x2d10   :  { %1806 = vrot.lane.b32.xlu1 %v2587_v7, %s2613_s11 }
0x2d11   :  { %v2589_v37 = vpop.eup %2588 }
0x2d12   :  { %v1800_v39 = vadd.f32 1.0, %v2589_v37 }
0x2d14   :  { %2590 = vrcp.f32 %v1800_v39 }
0x2d1e   :  { %v2591_v40 = vpop.eup %2590 }
0x2d1f   :  { %v1804_v51 = vmul.f32 %v2591_v40, %v1741_v24 }
0x2d82   :  { %v1807_v41 = vpop.permute.xlu1 %1806 }
0x2d83   :  { %v1809_v17 = vmul.f32 %v2591_v40, %v1807_v41 }
0x2d85   :  { %1811 = vrot.lane.b32.xlu0 %v1809_v17, %s2613_s11 }
0x2df7   :  { %v1812_v44 = vpop.permute.xlu0 %1811 }
0x2df8   :  { %v1814_v47 = vadd.f32 %v1812_v44, %v1804_v51 }
0x2dfa   :  { %2592 = vtanh.f32 %v1814_v47 }
0x2e04   :  { %v2593_v43 = vpop.eup %2592 }
0x2e05   :  { %1817 = vrot.lane.b32.xlu1 %v2593_v43, %s2613_s11 }
0x2e77   :  { %v1818_v50 = vpop.permute.xlu1 %1817 }
0x2e78   :  { %v1820_v52 = vmul.f32 %v2591_v40, %v1818_v50 }
0x2e7a   :  { %v1822_v54 = vpack.c.bf16 %v1820_v52, %v1820_v52 }
0x2e7c   :  { %1824 = vrot.lane.b32.xlu0 %v1822_v54, %s2614_s3 }
0x2eee   :  { %v1825_v10 = vpop.permute.xlu0 %1824 }
0x2eef   :  { %2402 = vmatmul.mubr.msk.bf16.vlgmr.msra.gmra.mrb[60].mxu1 %vm298_vm1, %v1825_v10 }
0x2ef0   :  { %2417 = vmatprep.mubr.msk.bf16.mxu1 %vm2611_vm0, %v2610_v1  ;;  %2414 = vmatpush3.bf16.msra.mxu1 %v2448_v25 }
0x2ef1   :  { %2415 = vmatprep.subr.bf16.mxu1 %v2610_v1 }
0x2ef4   :  { %2416 = vmatpush3.bf16.msra.mxu1 %v2449_v26 }
0x2fc2   :  { %v1863_v55 = vpop.f32.mrb[60].mxu1 }
0x2fc3   :  { %v1869_v56 = vadd.f32 %v1863_v55, %v1216_v46  ;;  %v2403_v9 = vpop.f32.mrb[61].mxu1 }
0x2fc4   :  { %v1866_v57 = vpop.f32.mrb[62].mxu1 }
0x2fc5   :  { %2594 = vtanh.f32 %v1869_v56  ;;  %v2404_v12 = vpop.f32.mrb[63].mxu1  ;;  %v2106_v16 = vmul.f32 -1.442695, %v1869_v56 }
0x2fc7   :  { %2596 = vpow2.f32 %v2106_v16 }
0x2fcf   :  { %v2595_v21 = vpop.eup %2594 }
0x2fd0   :  { %1879 = vrot.lane.b32.xlu1 %v2595_v21, %s2613_s11 }
0x2fd1   :  { %v2597_v58 = vpop.eup %2596 }
0x2fd2   :  { %v1873_v59 = vadd.f32 1.0, %v2597_v58 }
0x2fd4   :  { %2598 = vrcp.f32 %v1873_v59 }
0x2fde   :  { %v2599_v60 = vpop.eup %2598 }
0x2fdf   :  { %v1877_v48 = vmul.f32 %v2599_v60, %v1814_v47 }
0x3042   :  { %v1880_v61 = vpop.permute.xlu1 %1879 }
0x3043   :  { %v1882_v63 = vmul.f32 %v2599_v60, %v1880_v61 }
0x3045   :  { %1884 = vrot.lane.b32.xlu0 %v1882_v63, %s2613_s11 }
0x30b7   :  { %v1885_v0 = vpop.permute.xlu0 %1884 }
0x30b8   :  { %v1887_v2 = vadd.f32 %v1885_v0, %v1877_v48 }
0x30ba   :  { %2600 = vtanh.f32 %v1887_v2 }
0x30c4   :  { %v2601_v38 = vpop.eup %2600 }
0x30c5   :  { %1890 = vrot.lane.b32.xlu1 %v2601_v38, %s2613_s11 }
0x3137   :  { %v1891_v3 = vpop.permute.xlu1 %1890 }
0x3138   :  { %v1893_v4 = vmul.f32 %v2599_v60, %v1891_v3 }
0x313a   :  { %v1895_v5 = vpack.c.bf16 %v1893_v4, %v1893_v4 }
0x313c   :  { %1897 = vrot.lane.b32.xlu0 %v1895_v5, %s2614_s3 }
0x31ae   :  { %v1898_v32 = vpop.permute.xlu0 %1897 }
0x31af   :  { %2410 = vmatmul.mubr.msk.bf16.vlgmr.msra.gmra.mrb[52].mxu0 %vm298_vm1, %v1898_v32 }
0x3282   :  { %v1936_v8 = vpop.f32.mrb[52].mxu0 }
0x3283   :  { %v1942_v42 = vadd.f32 %v1936_v8, %v1219_v6  ;;  %v2411_v11 = vpop.f32.mrb[53].mxu0 }
0x3284   :  { %v1939_v45 = vpop.f32.mrb[54].mxu0 }
0x3285   :  { %2602 = vtanh.f32 %v1942_v42  ;;  %v2412_v13 = vpop.f32.mrb[55].mxu0  ;;  %v2108_v15 = vmul.f32 -1.442695, %v1942_v42 }
0x3287   :  { %2604 = vpow2.f32 %v2108_v15 }
0x328f   :  { %v2603_v14 = vpop.eup %2602 }
0x3290   :  { %1952 = vrot.lane.b32.xlu1 %v2603_v14, %s2613_s11 }
0x3291   :  { %v2605_v18 = vpop.eup %2604 }
0x3292   :  { %v1946_v19 = vadd.f32 1.0, %v2605_v18 }
0x3294   :  { %2606 = vrcp.f32 %v1946_v19 }
0x329e   :  { %v2607_v20 = vpop.eup %2606 }
0x329f   :  { %v1950_v62 = vmul.f32 %v2607_v20, %v1887_v2 }
0x3302   :  { %v1953_v22 = vpop.permute.xlu1 %1952 }
0x3303   :  { %v1955_v23 = vmul.f32 %v2607_v20, %v1953_v22 }
0x3305   :  { %1957 = vrot.lane.b32.xlu0 %v1955_v23, %s2613_s11 }
0x3377   :  { %v1958_v49 = vpop.permute.xlu0 %1957 }
0x3378   :  { %v1960_v24 = vadd.f32 %v1958_v49, %v1950_v62 }
0x337a   :  { %2608 = vtanh.f32 %v1960_v24 }
0x3384   :  { %v2609_v27 = vpop.eup %2608 }
0x3385   :  { %1963 = vrot.lane.b32.xlu1 %v2609_v27, %s2613_s11 }
0x33f7   :  { %v1964_v28 = vpop.permute.xlu1 %1963 }
0x33f8   :  { %v1966_v29 = vmul.f32 %v2607_v20, %v1964_v28 }
0x33fa   :  { %v1967_v30 = vpack.c.bf16 %v1966_v29, %v1966_v29 }
0x33fc   :  { %1980 = vrot.lane.b32.xlu0 %v1967_v30, %s2614_s3 }
0x346e   :  { %v1981_v31 = vpop.permute.xlu0 %1980 }
0x346f   :  { %2418 = vmatmul.mubr.msk.bf16.vlgmr.msra.gmra.mrb[64].mxu1 %vm298_vm1, %v1981_v31 }
0x3542   :  { %v2031_v34 = vpop.f32.mrb[64].mxu1 }
0x3543   :  { %v2032_v35 = vadd.f32 %v2109_v33, %v2031_v34  ;;  %v2419_v36 = vpop.f32.mrb[65].mxu1 }
0x3544   :  { %v2034_v1 = vpop.f32.mrb[66].mxu1 }
0x3545   :  { %2037 = vst [vmem:[%s3183_s9] sm:$0xff] %v2032_v35  ;;  %v2420_v7 = vpop.f32.mrb[67].mxu1 }

</bundles_post_ra>
